<compile_context>
chip_gen: v6e
topology: v6e:2x2x1
jax: 0.10.0
libtpu: 0.0.40
codegen_flags: <defaults>
</compile_context>

<pallas_src>
import functools
import math

import jax
import jax.numpy as jnp
from jax.experimental import pallas as pl
from jax.experimental.pallas import tpu as pltpu  # noqa: F401

# ----------------------------- config ---------------------------------------
B = 2            # batch
S = 8            # sequence length
H = 32           # hidden size (model.config.hidden_size)
NH = 8           # num_heads (nn.MultiheadAttention(num_heads=8))
DH = H // NH     # head dim
F = 4 * H        # BERT intermediate size (=128, one lane tile)
H3 = 3 * H       # fused QKV width
BS = B * S       # folded batch*seq rows (=16)
KW = NH * BS     # head-major key lane width of the score slab (=128)
VOCAB = 50
EOS_ID = 3
N_LAYERS = 2
LN_EPS = 1e-12
NEG = -1e9       # single mask sentinel everywhere

# 128-lane-aligned packed "A" slab columns: [ wqkv(96)+pad | wo(32)+pad | w1(128) ]
WA_QKV = 0
WA_O = 128
WA_FF1 = 256
WA_COLS = 384


# --------------------------- in-kernel helpers --------------------------------
def _layernorm(x, g, b):
    mu = jnp.mean(x, axis=-1, keepdims=True)
    var = jnp.mean((x - mu) ** 2, axis=-1, keepdims=True)
    return (x - mu) * jax.lax.rsqrt(var + LN_EPS) * g + b


def _gelu(x):
    # exact (erf) GELU, as used by BERT
    return 0.5 * x * (1.0 + jax.lax.erf(x * (1.0 / jnp.sqrt(jnp.float32(2.0)))))


def _attention(q, k, v, bias, kmask, vmask, spread_k, spread_v):
    """Row-folded, head-lane-blocked multi-head attention.

    q:(Tq,H)   query, 1/sqrt(DH) already folded into the Q weights
    k,v:(BS,H) keys/values for ALL folded rows
    bias:(Tq,KW) additive; encodes batch block-diagonal + padding (NEG sentinel)
    kmask:(H,KW) / vmask:(KW,H): head block-diagonal selectors
    spread_k:(BS,KW) / spread_v:(KW,BS): identity tiled per head (MXU "replicate")

    Scores are (Tq, KW) with the key axis head-major, so exp/select are lane-dense
    and every contraction is a single MXU matmul (no per-head loops).
    """
    kt = k.T                                                                  # (H, BS)
    kblk = jnp.dot(kt, spread_k, preferred_element_type=jnp.float32) * kmask  # (H, KW)
    s = jnp.dot(q, kblk, preferred_element_type=jnp.float32) + bias           # (Tq, KW)
    # the per-row max is constant within every head block -> per-block softmax exact
    p = jnp.exp(s - jnp.max(s, axis=-1, keepdims=True))
    vblk = jnp.dot(spread_v, v, preferred_element_type=jnp.float32) * vmask   # (KW, H)
    ctx = jnp.dot(p, vblk, preferred_element_type=jnp.float32)                # (Tq, H)
    den = jnp.dot(p, vmask, preferred_element_type=jnp.float32)               # (Tq, H)
    return ctx * pl.reciprocal(jnp.maximum(den, 1e-30), approx=True)


# --------------------------- fused forward kernel -----------------------------
def _make_kernel(method):
    needs_sel = method in ("cls", "eos", "attn_pool_cls", "attn_pool_eos")
    needs_mha = method in ("attn_pool_cls", "attn_pool_eos")

    def kernel(*refs):
        it = iter(refs)
        x_ref = next(it)                         # (BS, H) folded activations
        bias_ref = next(it)                      # (BS, KW) encoder attention bias
        kmask_ref = next(it)                     # (H, KW)
        vmask_ref = next(it)                     # (KW, H)
        spk_ref = next(it)                       # (BS, KW)
        spv_ref = next(it)                       # (KW, BS)
        wa_ref = next(it)                        # (L, H, 384) [wqkv|pad|wo|pad|w1]
        w2_ref = next(it)                        # (L, F, H)
        vec_ref = next(it)                       # (L, 8, 128) bias / LN rows
        sel_ref = next(it) if needs_sel else None            # (B, BS) row selector
        msum_ref = next(it) if method == "mean_pool" else None  # (B, BS) mask rows
        amm_ref = next(it) if method == "max_pool" else None    # (BS, H) token mask
        if needs_mha:
            pbias_ref = next(it)                 # (B, KW) pooling attention bias
            mw_ref = next(it)                    # (H, 256) [wq|wk|wv|pad|wo]
            mv_ref = next(it)                    # (2, 128) [bqkv ; bo]
        out_ref = next(it)                       # (B, H)

        x = x_ref[...]
        enc_bias = bias_ref[...]                 # hoisted: built once in glue
        kmask = kmask_ref[...]
        vmask = vmask_ref[...]
        spread_k = spk_ref[...]
        spread_v = spv_ref[...]

        # ---------------- transformer encoder (static unroll, L=2) ---------------
        # TODO(synk): switch to lax.fori_loop / layer-grid once N_LAYERS > ~4.
        for l in range(N_LAYERS):
            wa = wa_ref[l]                       # (H, 384)
            w2 = w2_ref[l]                       # (F, H)
            vec = vec_ref[l]                     # (8, 128)

            # fused QKV projection with the full 128-wide (zero-padded) weight tile
            qkv = jnp.dot(x, wa[:, WA_QKV:WA_QKV + 128],
                          preferred_element_type=jnp.float32) + vec[0:1, 0:128]
            ctx = _attention(qkv[:, 0:H], qkv[:, H:2 * H], qkv[:, 2 * H:H3],
                             enc_bias, kmask, vmask, spread_k, spread_v)
            attn_out = jnp.dot(ctx, wa[:, WA_O:WA_O + H],
                               preferred_element_type=jnp.float32) + vec[1:2, 0:H]
            h1 = _layernorm(x + attn_out, vec[4:5, 0:H], vec[5:6, 0:H])

            ff = _gelu(jnp.dot(h1, wa[:, WA_FF1:WA_FF1 + F],
                               preferred_element_type=jnp.float32) + vec[2:3, 0:F])
            ff2 = jnp.dot(ff, w2, preferred_element_type=jnp.float32) + vec[3:4, 0:H]
            x = _layernorm(h1 + ff2, vec[6:7, 0:H], vec[7:8, 0:H])

        # ---------------- pooling epilogue (activations already in VMEM) ----------
        if method in ("cls", "eos"):
            out_ref[...] = jnp.dot(sel_ref[...], x,
                                   preferred_element_type=jnp.float32)       # (B,H)
        elif method == "mean_pool":
            msum = msum_ref[...]                                             # (B,BS)
            summed = jnp.dot(msum, x, preferred_element_type=jnp.float32)
            cnt = jnp.maximum(jnp.sum(msum, axis=-1, keepdims=True), 1e-9)
            out_ref[...] = summed * pl.reciprocal(cnt, approx=True)
        elif method == "max_pool":
            # TODO(synk): reference returns the torch.max(...,dim=1) (values, indices)
            # tuple; we return values only.
            masked = jnp.where(amm_ref[...] > 0.0, x, jnp.float32(NEG))
            for b in range(B):
                out_ref[b:b + 1, :] = jnp.max(masked[b * S:(b + 1) * S, :],
                                              axis=0, keepdims=True)
        else:  # attn_pool_cls / attn_pool_eos
            mw = mw_ref[...]
            mv = mv_ref[...]
            query = jnp.dot(sel_ref[...], x, preferred_element_type=jnp.float32)  # (B,H)
            qp = jnp.dot(query, mw[:, 0:H],
                         preferred_element_type=jnp.float32) + mv[0:1, 0:H]
            kv = jnp.dot(x, mw[:, H:H3],
                         preferred_element_type=jnp.float32) + mv[0:1, H:H3]      # (BS,2H)
            # TODO(synk): reference passes attention_mask (1 = real token) straight
            # into key_padding_mask, so REAL tokens are the ones masked out; that
            # behaviour is reproduced as-is via the precomputed pooling bias.
            ctx = _attention(qp, kv[:, 0:H], kv[:, H:2 * H], pbias_ref[...],
                             kmask, vmask, spread_k, spread_v)                    # (B,H)
            out_ref[...] = jnp.dot(ctx, mw[:, 128:128 + H],
                                   preferred_element_type=jnp.float32) + mv[1:2, 0:H]

    return kernel


def _cost_estimate(input_bytes):
    attn_mm = 2 * (BS * H * 128 + H * BS * KW + BS * H * KW
                   + KW * BS * H + 2 * BS * KW * H + BS * H * H)
    ffn_mm = 2 * (BS * H * F + BS * F * H)
    flops = N_LAYERS * (attn_mm + ffn_mm) + 8 * B * BS * H
    transcend = N_LAYERS * (BS * KW + BS * F + 2 * BS) + B * KW
    return pl.CostEstimate(flops=flops, transcendentals=transcend,
                           bytes_accessed=input_bytes + B * H * 4)


def _fused_forward(method, x_flat, enc_bias, kmask, vmask, spread_k, spread_v,
                   enc_pack, mha_pack, sel=None, msum=None, ammask=None,
                   pool_bias=None):
    inputs = [x_flat, enc_bias, kmask, vmask, spread_k, spread_v,
              enc_pack["wa"], enc_pack["w2"], enc_pack["vec"]]
    if method in ("cls", "eos", "attn_pool_cls", "attn_pool_eos"):
        inputs.append(sel)
    if method == "mean_pool":
        inputs.append(msum)
    if method == "max_pool":
        inputs.append(ammask)
    if method in ("attn_pool_cls", "attn_pool_eos"):
        inputs += [pool_bias, mha_pack["mw"], mha_pack["mv"]]

    input_bytes = sum(math.prod(a.shape) for a in inputs) * 4
    # Single invocation, no grid: all operands are whole-array VMEM refs (<1 MiB total),
    # so there is zero grid-step overhead and the weights are DMA'd exactly once.
    # Output is (B,H)=(2,32): masked store, negligible at toy size (pad to 128 lanes
    # only if profiling ever shows a store tail).
    return pl.pallas_call(
        _make_kernel(method),
        out_shape=jax.ShapeDtypeStruct((B, H), jnp.float32),
        cost_estimate=_cost_estimate(input_bytes),
    )(*inputs)


# ------------------------------ glue / wrapper --------------------------------
def init_params(key):
    def nrm(k, shape):
        return 0.02 * jax.random.normal(k, shape, dtype=jnp.float32)

    keys = iter(jax.random.split(key, 64))
    params = {
        "word_emb": nrm(next(keys), (VOCAB, H)),
        "pos_emb": nrm(next(keys), (S, H)),
        "type_emb": nrm(next(keys), (2, H)),
        "emb_g": jnp.ones((H,), jnp.float32),
        "emb_b": jnp.zeros((H,), jnp.float32),
        "layers": [],
    }
    for _ in range(N_LAYERS):
        params["layers"].append({
            "wq": nrm(next(keys), (H, H)), "bq": jnp.zeros((1, H), jnp.float32),
            "wk": nrm(next(keys), (H, H)), "bk": jnp.zeros((1, H), jnp.float32),
            "wv": nrm(next(keys), (H, H)), "bv": jnp.zeros((1, H), jnp.float32),
            "wo": nrm(next(keys), (H, H)), "bo": jnp.zeros((1, H), jnp.float32),
            "g1": jnp.ones((1, H), jnp.float32), "be1": jnp.zeros((1, H), jnp.float32),
            "w1": nrm(next(keys), (H, F)), "b1": jnp.zeros((1, F), jnp.float32),
            "w2": nrm(next(keys), (F, H)), "b2": jnp.zeros((1, H), jnp.float32),
            "g2": jnp.ones((1, H), jnp.float32), "be2": jnp.zeros((1, H), jnp.float32),
        })
    # nn.MultiheadAttention params: in_proj_weight (3H,H), in_proj_bias (3H,),
    # out_proj (H,H)+(H,).  Pre-split/transpose so the kernel does x @ W_t + b.
    in_w = nrm(next(keys), (3 * H, H))
    in_b = jnp.zeros((3 * H,), jnp.float32)
    out_w = nrm(next(keys), (H, H))
    out_b = jnp.zeros((H,), jnp.float32)
    params["mha"] = {
        "wq": in_w[0 * H:1 * H].T, "bq": in_b[0 * H:1 * H].reshape(1, H),
        "wk": in_w[1 * H:2 * H].T, "bk": in_b[1 * H:2 * H].reshape(1, H),
        "wv": in_w[2 * H:3 * H].T, "bv": in_b[2 * H:3 * H].reshape(1, H),
        "wo": out_w.T, "bo": out_b.reshape(1, H),
    }
    return params


def pack_params(params):
    """Pack weights into 128-lane-aligned slabs (done once, in glue).

    wa  (L, H, 384): cols [0:96]  = [wq*scale | wk | wv]   (pad to 128)
                     cols [128:160] = wo                    (pad to 256)
                     cols [256:384] = w1
    vec (L, 8, 128): rows = bqkv(scaled q) | bo | b1 | b2 | g1 | be1 | g2 | be2
    The 1/sqrt(DH) attention scale is folded into the Q weights/bias here.
    TODO(synk): cast the slabs to bf16 at real BERT sizes (keep f32 accumulation).
    """
    scale = 1.0 / math.sqrt(DH)
    wa_l, w2_l, vec_l = [], [], []
    for lp in params["layers"]:
        wqkv = jnp.concatenate([lp["wq"] * scale, lp["wk"], lp["wv"]], axis=1)  # (H,96)
        wa = jnp.zeros((H, WA_COLS), jnp.float32)
        wa = wa.at[:, WA_QKV:WA_QKV + H3].set(wqkv)
        wa = wa.at[:, WA_O:WA_O + H].set(lp["wo"])
        wa = wa.at[:, WA_FF1:WA_FF1 + F].set(lp["w1"])

        bqkv = jnp.concatenate([lp["bq"] * scale, lp["bk"], lp["bv"]], axis=1)  # (1,96)
        vec = jnp.zeros((8, 128), jnp.float32)
        vec = vec.at[0, 0:H3].set(bqkv[0])
        vec = vec.at[1, 0:H].set(lp["bo"][0])
        vec = vec.at[2, 0:F].set(lp["b1"][0])
        vec = vec.at[3, 0:H].set(lp["b2"][0])
        vec = vec.at[4, 0:H].set(lp["g1"][0])
        vec = vec.at[5, 0:H].set(lp["be1"][0])
        vec = vec.at[6, 0:H].set(lp["g2"][0])
        vec = vec.at[7, 0:H].set(lp["be2"][0])

        wa_l.append(wa)
        w2_l.append(lp["w2"])
        vec_l.append(vec)
    enc_pack = {"wa": jnp.stack(wa_l),      # (L, H, 384)
                "w2": jnp.stack(w2_l),      # (L, F, H)
                "vec": jnp.stack(vec_l)}    # (L, 8, 128)

    m = params["mha"]
    mw = jnp.zeros((H, 256), jnp.float32)
    mw = mw.at[:, 0:H].set(m["wq"] * scale)
    mw = mw.at[:, H:2 * H].set(m["wk"])
    mw = mw.at[:, 2 * H:H3].set(m["wv"])
    mw = mw.at[:, 128:128 + H].set(m["wo"])
    mv = jnp.zeros((2, 128), jnp.float32)
    mv = mv.at[0, 0:H].set(m["bq"][0] * scale)
    mv = mv.at[0, H:2 * H].set(m["bk"][0])
    mv = mv.at[0, 2 * H:H3].set(m["bv"][0])
    mv = mv.at[1, 0:H].set(m["bo"][0])
    return enc_pack, {"mw": mw, "mv": mv}


@functools.partial(jax.jit, static_argnames=("embedding_method",))
def bert_sentence_encoder_forward(params, enc_pack, mha_pack, input_ids,
                                  attention_mask, *, embedding_method):
    if embedding_method not in ("cls", "eos", "mean_pool", "max_pool",
                                "attn_pool_cls", "attn_pool_eos"):
        raise ValueError(f"The embedding type {embedding_method} does not exist")

    am_f = attention_mask.astype(jnp.float32)

    # synthetic backbone embeddings: gather stays in XLA glue
    emb = (params["word_emb"][input_ids]
           + params["pos_emb"][None, :, :]
           + params["type_emb"][0][None, None, :])
    mu = jnp.mean(emb, axis=-1, keepdims=True)
    var = jnp.mean((emb - mu) ** 2, axis=-1, keepdims=True)
    x = (emb - mu) * jax.lax.rsqrt(var + LN_EPS) * params["emb_g"] + params["emb_b"]
    x_flat = x.reshape(BS, H)                                   # batch folded into rows

    am_flat = am_f.reshape(BS)
    batch_of_row = jnp.repeat(jnp.arange(B), S)                 # (BS,)
    same_qk = batch_of_row[:, None] == batch_of_row[None, :]    # (BS,BS)

    # encoder attention bias: block-diagonal over batches + padded keys masked out
    enc_bias = jnp.tile(jnp.where(same_qk & (am_flat[None, :] > 0.5), 0.0, NEG),
                        (1, NH)).astype(jnp.float32)            # (BS, KW)

    # head block-diagonal selectors + per-head key "spread" (identity tiled NH times)
    head_of_col = jnp.arange(H) // DH
    head_of_key = jnp.arange(KW) // BS
    kmask = (head_of_col[:, None] == head_of_key[None, :]).astype(jnp.float32)  # (H,KW)
    vmask = kmask.T                                                             # (KW,H)
    spread_k = (jnp.arange(BS)[:, None]
                == (jnp.arange(KW)[None, :] % BS)).astype(jnp.float32)          # (BS,KW)
    spread_v = spread_k.T                                                       # (KW,BS)

    sel = msum = ammask = pool_bias = None
    if embedding_method in ("cls", "attn_pool_cls"):
        pos = jnp.zeros((B,), jnp.int32)
    elif embedding_method in ("eos", "attn_pool_eos"):
        # TODO(synk): rows without an EOS silently select position 0 (argmax fallback).
        pos = jnp.argmax((input_ids == EOS_ID).astype(jnp.int32), axis=1).astype(jnp.int32)
    else:
        pos = None
    if pos is not None:
        sel = jax.nn.one_hot(jnp.arange(B) * S + pos, BS, dtype=jnp.float32)   # (B,BS)

    same_b = jnp.arange(B)[:, None] == batch_of_row[None, :]                   # (B,BS)
    if embedding_method == "mean_pool":
        msum = jnp.where(same_b, am_flat[None, :], 0.0).astype(jnp.float32)
    if embedding_method == "max_pool":
        ammask = jnp.broadcast_to(am_flat[:, None], (BS, H)).astype(jnp.float32)
    if embedding_method in ("attn_pool_cls", "attn_pool_eos"):
        # reference bug reproduced: nonzero attention_mask (real tokens) => key ignored
        keep = same_b & (am_flat[None, :] < 0.5)
        pool_bias = jnp.tile(jnp.where(keep, 0.0, NEG),
                             (1, NH)).astype(jnp.float32)                      # (B,KW)

    return _fused_forward(embedding_method, x_flat, enc_bias, kmask, vmask,
                          spread_k, spread_v, enc_pack, mha_pack,
                          sel=sel, msum=msum, ammask=ammask, pool_bias=pool_bias)


# --------------------------------- main ---------------------------------------
if __name__ == "__main__":
    key = jax.random.PRNGKey(0)
    pkey, dkey = jax.random.split(key)
    params = init_params(pkey)
    enc_pack, mha_pack = pack_params(params)

    # deterministic toy batch: lengths [6, 5], EOS at last real position, rest pad
    ids = jax.random.randint(dkey, (B, S), 5, VOCAB, dtype=jnp.int32)
    lengths = [6, 5]
    ids_list, mask_list = [], []
    for b in range(B):
        L = lengths[b]
        row = jnp.concatenate([ids[b, :L - 1],
                               jnp.array([EOS_ID], jnp.int32),
                               jnp.zeros((S - L,), jnp.int32)])
        ids_list.append(row)
        mask_list.append(jnp.concatenate([jnp.ones((L,), jnp.int32),
                                          jnp.zeros((S - L,), jnp.int32)]))
    input_ids = jnp.stack(ids_list)
    attention_mask = jnp.stack(mask_list)

    for method in ["cls", "eos", "mean_pool", "max_pool",
                   "attn_pool_cls", "attn_pool_eos"]:
        out = bert_sentence_encoder_forward(params, enc_pack, mha_pack,
                                            input_ids, attention_mask,
                                            embedding_method=method)
        out = jax.block_until_ready(out)
        assert out.shape == (B, H), (method, out.shape)
        assert bool(jnp.all(jnp.isfinite(out))), method

    print("KERNEL_OK")
</pallas_src>

<mosaic_0001>
module attributes {stable_mosaic.version = 11 : i64} {
  func.func @kernel(%arg0: memref<16x32xf32, #tpu.memory_space<vmem>>, %arg1: memref<16x128xf32, #tpu.memory_space<vmem>>, %arg2: memref<32x128xf32, #tpu.memory_space<vmem>>, %arg3: memref<128x32xf32, #tpu.memory_space<vmem>>, %arg4: memref<16x128xf32, #tpu.memory_space<vmem>>, %arg5: memref<128x16xf32, #tpu.memory_space<vmem>>, %arg6: memref<2x32x384xf32, #tpu.memory_space<vmem>>, %arg7: memref<2x128x32xf32, #tpu.memory_space<vmem>>, %arg8: memref<2x8x128xf32, #tpu.memory_space<vmem>>, %arg9: memref<2x16xf32, #tpu.memory_space<vmem>>, %arg10: memref<2x32xf32, #tpu.memory_space<vmem>>) attributes {dimension_semantics = [], scalar_prefetch = 0 : i64, scratch_operands = 0 : i64, tpu.core_type = #tpu.core_type<tc>} {
    %c0 = arith.constant 0 : index
    %c0_0 = arith.constant 0 : index
    %0 = vector.load %arg0[%c0, %c0_0] : memref<16x32xf32, #tpu.memory_space<vmem>>, vector<16x32xf32>
    %c0_1 = arith.constant 0 : index
    %c0_2 = arith.constant 0 : index
    %1 = vector.load %arg1[%c0_1, %c0_2] : memref<16x128xf32, #tpu.memory_space<vmem>>, vector<16x128xf32>
    %c0_3 = arith.constant 0 : index
    %c0_4 = arith.constant 0 : index
    %2 = vector.load %arg2[%c0_3, %c0_4] : memref<32x128xf32, #tpu.memory_space<vmem>>, vector<32x128xf32>
    %c0_5 = arith.constant 0 : index
    %c0_6 = arith.constant 0 : index
    %3 = vector.load %arg3[%c0_5, %c0_6] : memref<128x32xf32, #tpu.memory_space<vmem>>, vector<128x32xf32>
    %c0_7 = arith.constant 0 : index
    %c0_8 = arith.constant 0 : index
    %4 = vector.load %arg4[%c0_7, %c0_8] : memref<16x128xf32, #tpu.memory_space<vmem>>, vector<16x128xf32>
    %c0_9 = arith.constant 0 : index
    %c0_10 = arith.constant 0 : index
    %5 = vector.load %arg5[%c0_9, %c0_10] : memref<128x16xf32, #tpu.memory_space<vmem>>, vector<128x16xf32>
    %c0_11 = arith.constant 0 : index
    %c0_12 = arith.constant 0 : index
    %c0_13 = arith.constant 0 : index
    %6 = vector.load %arg6[%c0_11, %c0_12, %c0_13] : memref<2x32x384xf32, #tpu.memory_space<vmem>>, vector<1x32x384xf32>
    %7 = vector.shape_cast %6 : vector<1x32x384xf32> to vector<32x384xf32>
    %c0_14 = arith.constant 0 : index
    %c0_15 = arith.constant 0 : index
    %c0_16 = arith.constant 0 : index
    %8 = vector.load %arg7[%c0_14, %c0_15, %c0_16] : memref<2x128x32xf32, #tpu.memory_space<vmem>>, vector<1x128x32xf32>
    %9 = vector.shape_cast %8 : vector<1x128x32xf32> to vector<128x32xf32>
    %c0_17 = arith.constant 0 : index
    %c0_18 = arith.constant 0 : index
    %c0_19 = arith.constant 0 : index
    %10 = vector.load %arg8[%c0_17, %c0_18, %c0_19] : memref<2x8x128xf32, #tpu.memory_space<vmem>>, vector<1x8x128xf32>
    %11 = vector.shape_cast %10 : vector<1x8x128xf32> to vector<8x128xf32>
    %12 = vector.extract_strided_slice %7 {offsets = [0, 0], sizes = [32, 128], strides = [1, 1]} : vector<32x384xf32> to vector<32x128xf32>
    %cst = arith.constant dense<0.000000e+00> : vector<16x128xf32>
    %13 = tpu.matmul %0, %12, %cst {dimension_numbers = #tpu.dot_dimension_numbers<[1], [0], [0], [1], [0, 0, 1, 1], [], []>} : vector<16x32xf32>, vector<32x128xf32>, vector<16x128xf32> -> vector<16x128xf32>
    %14 = vector.extract_strided_slice %11 {offsets = [0, 0], sizes = [1, 128], strides = [1, 1]} : vector<8x128xf32> to vector<1x128xf32>
    %15 = vector.broadcast %14 : vector<1x128xf32> to vector<16x128xf32>
    %16 = arith.addf %13, %15 : vector<16x128xf32>
    %17 = vector.extract_strided_slice %16 {offsets = [0, 0], sizes = [16, 32], strides = [1, 1]} : vector<16x128xf32> to vector<16x32xf32>
    %18 = vector.extract_strided_slice %16 {offsets = [0, 32], sizes = [16, 32], strides = [1, 1]} : vector<16x128xf32> to vector<16x32xf32>
    %19 = vector.extract_strided_slice %16 {offsets = [0, 64], sizes = [16, 32], strides = [1, 1]} : vector<16x128xf32> to vector<16x32xf32>
    %20 = tpu.transpose %18, [1, 0] : vector<16x32xf32> -> vector<32x16xf32>
    %cst_20 = arith.constant dense<0.000000e+00> : vector<32x128xf32>
    %21 = tpu.matmul %20, %4, %cst_20 {dimension_numbers = #tpu.dot_dimension_numbers<[1], [0], [0], [1], [0, 0, 1, 1], [], []>} : vector<32x16xf32>, vector<16x128xf32>, vector<32x128xf32> -> vector<32x128xf32>
    %22 = arith.mulf %21, %2 : vector<32x128xf32>
    %cst_21 = arith.constant dense<0.000000e+00> : vector<16x128xf32>
    %23 = tpu.matmul %17, %22, %cst_21 {dimension_numbers = #tpu.dot_dimension_numbers<[1], [0], [0], [1], [0, 0, 1, 1], [], []>} : vector<16x32xf32>, vector<32x128xf32>, vector<16x128xf32> -> vector<16x128xf32>
    %24 = arith.addf %23, %1 : vector<16x128xf32>
    %cst_22 = arith.constant dense<0xFF800000> : vector<16xf32>
    %25 = vector.multi_reduction <maximumf>, %24, %cst_22 [1] : vector<16x128xf32> to vector<16xf32>
    %26 = vector.shape_cast %25 : vector<16xf32> to vector<16x1xf32>
    %27 = vector.broadcast %26 : vector<16x1xf32> to vector<16x128xf32>
    %28 = arith.subf %24, %27 : vector<16x128xf32>
    %29 = math.exp %28 : vector<16x128xf32>
    %cst_23 = arith.constant dense<0.000000e+00> : vector<128x32xf32>
    %30 = tpu.matmul %5, %19, %cst_23 {dimension_numbers = #tpu.dot_dimension_numbers<[1], [0], [0], [1], [0, 0, 1, 1], [], []>} : vector<128x16xf32>, vector<16x32xf32>, vector<128x32xf32> -> vector<128x32xf32>
    %31 = arith.mulf %30, %3 : vector<128x32xf32>
    %cst_24 = arith.constant dense<0.000000e+00> : vector<16x32xf32>
    %32 = tpu.matmul %29, %31, %cst_24 {dimension_numbers = #tpu.dot_dimension_numbers<[1], [0], [0], [1], [0, 0, 1, 1], [], []>} : vector<16x128xf32>, vector<128x32xf32>, vector<16x32xf32> -> vector<16x32xf32>
    %cst_25 = arith.constant dense<0.000000e+00> : vector<16x32xf32>
    %33 = tpu.matmul %29, %3, %cst_25 {dimension_numbers = #tpu.dot_dimension_numbers<[1], [0], [0], [1], [0, 0, 1, 1], [], []>} : vector<16x128xf32>, vector<128x32xf32>, vector<16x32xf32> -> vector<16x32xf32>
    %cst_26 = arith.constant 1.000000e-30 : f32
    %34 = vector.broadcast %cst_26 : f32 to vector<16x32xf32>
    %35 = arith.maximumf %33, %34 : vector<16x32xf32>
    %36 = tpu.reciprocal %35 {approx = true} : vector<16x32xf32> -> vector<16x32xf32>
    %37 = arith.mulf %32, %36 : vector<16x32xf32>
    %38 = vector.extract_strided_slice %7 {offsets = [0, 128], sizes = [32, 32], strides = [1, 1]} : vector<32x384xf32> to vector<32x32xf32>
    %cst_27 = arith.constant dense<0.000000e+00> : vector<16x32xf32>
    %39 = tpu.matmul %37, %38, %cst_27 {dimension_numbers = #tpu.dot_dimension_numbers<[1], [0], [0], [1], [0, 0, 1, 1], [], []>} : vector<16x32xf32>, vector<32x32xf32>, vector<16x32xf32> -> vector<16x32xf32>
    %40 = vector.extract_strided_slice %11 {offsets = [1, 0], sizes = [1, 32], strides = [1, 1]} : vector<8x128xf32> to vector<1x32xf32>
    %41 = vector.broadcast %40 : vector<1x32xf32> to vector<16x32xf32>
    %42 = arith.addf %39, %41 : vector<16x32xf32>
    %43 = arith.addf %0, %42 : vector<16x32xf32>
    %44 = vector.extract_strided_slice %11 {offsets = [4, 0], sizes = [1, 32], strides = [1, 1]} : vector<8x128xf32> to vector<1x32xf32>
    %45 = vector.extract_strided_slice %11 {offsets = [5, 0], sizes = [1, 32], strides = [1, 1]} : vector<8x128xf32> to vector<1x32xf32>
    %cst_28 = arith.constant dense<0.000000e+00> : vector<16xf32>
    %46 = vector.multi_reduction <add>, %43, %cst_28 [1] : vector<16x32xf32> to vector<16xf32>
    %47 = vector.shape_cast %46 : vector<16xf32> to vector<16x1xf32>
    %cst_29 = arith.constant 3.200000e+01 : f32
    %48 = vector.broadcast %cst_29 : f32 to vector<16x1xf32>
    %49 = arith.divf %47, %48 : vector<16x1xf32>
    %50 = vector.broadcast %49 : vector<16x1xf32> to vector<16x32xf32>
    %51 = arith.subf %43, %50 : vector<16x32xf32>
    %52 = arith.mulf %51, %51 : vector<16x32xf32>
    %cst_30 = arith.constant dense<0.000000e+00> : vector<16xf32>
    %53 = vector.multi_reduction <add>, %52, %cst_30 [1] : vector<16x32xf32> to vector<16xf32>
    %54 = vector.shape_cast %53 : vector<16xf32> to vector<16x1xf32>
    %cst_31 = arith.constant 3.200000e+01 : f32
    %55 = vector.broadcast %cst_31 : f32 to vector<16x1xf32>
    %56 = arith.divf %54, %55 : vector<16x1xf32>
    %57 = vector.broadcast %49 : vector<16x1xf32> to vector<16x32xf32>
    %58 = arith.subf %43, %57 : vector<16x32xf32>
    %cst_32 = arith.constant 9.99999996E-13 : f32
    %59 = vector.broadcast %cst_32 : f32 to vector<16x1xf32>
    %60 = arith.addf %56, %59 : vector<16x1xf32>
    %61 = math.rsqrt %60 : vector<16x1xf32>
    %62 = vector.broadcast %61 : vector<16x1xf32> to vector<16x32xf32>
    %63 = arith.mulf %58, %62 : vector<16x32xf32>
    %64 = vector.broadcast %44 : vector<1x32xf32> to vector<16x32xf32>
    %65 = arith.mulf %63, %64 : vector<16x32xf32>
    %66 = vector.broadcast %45 : vector<1x32xf32> to vector<16x32xf32>
    %67 = arith.addf %65, %66 : vector<16x32xf32>
    %68 = vector.extract_strided_slice %7 {offsets = [0, 256], sizes = [32, 128], strides = [1, 1]} : vector<32x384xf32> to vector<32x128xf32>
    %cst_33 = arith.constant dense<0.000000e+00> : vector<16x128xf32>
    %69 = tpu.matmul %67, %68, %cst_33 {dimension_numbers = #tpu.dot_dimension_numbers<[1], [0], [0], [1], [0, 0, 1, 1], [], []>} : vector<16x32xf32>, vector<32x128xf32>, vector<16x128xf32> -> vector<16x128xf32>
    %70 = vector.extract_strided_slice %11 {offsets = [2, 0], sizes = [1, 128], strides = [1, 1]} : vector<8x128xf32> to vector<1x128xf32>
    %71 = vector.broadcast %70 : vector<1x128xf32> to vector<16x128xf32>
    %72 = arith.addf %69, %71 : vector<16x128xf32>
    %cst_34 = arith.constant 5.000000e-01 : f32
    %73 = vector.broadcast %cst_34 : f32 to vector<16x128xf32>
    %74 = arith.mulf %73, %72 : vector<16x128xf32>
    %cst_35 = arith.constant 2.000000e+00 : f32
    %75 = math.sqrt %cst_35 : f32
    %cst_36 = arith.constant 1.000000e+00 : f32
    %76 = arith.divf %cst_36, %75 : f32
    %77 = vector.broadcast %76 : f32 to vector<16x128xf32>
    %78 = arith.mulf %72, %77 : vector<16x128xf32>
    %79 = math.erf %78 : vector<16x128xf32>
    %cst_37 = arith.constant 1.000000e+00 : f32
    %80 = vector.broadcast %cst_37 : f32 to vector<16x128xf32>
    %81 = arith.addf %80, %79 : vector<16x128xf32>
    %82 = arith.mulf %74, %81 : vector<16x128xf32>
    %cst_38 = arith.constant dense<0.000000e+00> : vector<16x32xf32>
    %83 = tpu.matmul %82, %9, %cst_38 {dimension_numbers = #tpu.dot_dimension_numbers<[1], [0], [0], [1], [0, 0, 1, 1], [], []>} : vector<16x128xf32>, vector<128x32xf32>, vector<16x32xf32> -> vector<16x32xf32>
    %84 = vector.extract_strided_slice %11 {offsets = [3, 0], sizes = [1, 32], strides = [1, 1]} : vector<8x128xf32> to vector<1x32xf32>
    %85 = vector.broadcast %84 : vector<1x32xf32> to vector<16x32xf32>
    %86 = arith.addf %83, %85 : vector<16x32xf32>
    %87 = arith.addf %67, %86 : vector<16x32xf32>
    %88 = vector.extract_strided_slice %11 {offsets = [6, 0], sizes = [1, 32], strides = [1, 1]} : vector<8x128xf32> to vector<1x32xf32>
    %89 = vector.extract_strided_slice %11 {offsets = [7, 0], sizes = [1, 32], strides = [1, 1]} : vector<8x128xf32> to vector<1x32xf32>
    %cst_39 = arith.constant dense<0.000000e+00> : vector<16xf32>
    %90 = vector.multi_reduction <add>, %87, %cst_39 [1] : vector<16x32xf32> to vector<16xf32>
    %91 = vector.shape_cast %90 : vector<16xf32> to vector<16x1xf32>
    %cst_40 = arith.constant 3.200000e+01 : f32
    %92 = vector.broadcast %cst_40 : f32 to vector<16x1xf32>
    %93 = arith.divf %91, %92 : vector<16x1xf32>
    %94 = vector.broadcast %93 : vector<16x1xf32> to vector<16x32xf32>
    %95 = arith.subf %87, %94 : vector<16x32xf32>
    %96 = arith.mulf %95, %95 : vector<16x32xf32>
    %cst_41 = arith.constant dense<0.000000e+00> : vector<16xf32>
    %97 = vector.multi_reduction <add>, %96, %cst_41 [1] : vector<16x32xf32> to vector<16xf32>
    %98 = vector.shape_cast %97 : vector<16xf32> to vector<16x1xf32>
    %cst_42 = arith.constant 3.200000e+01 : f32
    %99 = vector.broadcast %cst_42 : f32 to vector<16x1xf32>
    %100 = arith.divf %98, %99 : vector<16x1xf32>
    %101 = vector.broadcast %93 : vector<16x1xf32> to vector<16x32xf32>
    %102 = arith.subf %87, %101 : vector<16x32xf32>
    %cst_43 = arith.constant 9.99999996E-13 : f32
    %103 = vector.broadcast %cst_43 : f32 to vector<16x1xf32>
    %104 = arith.addf %100, %103 : vector<16x1xf32>
    %105 = math.rsqrt %104 : vector<16x1xf32>
    %106 = vector.broadcast %105 : vector<16x1xf32> to vector<16x32xf32>
    %107 = arith.mulf %102, %106 : vector<16x32xf32>
    %108 = vector.broadcast %88 : vector<1x32xf32> to vector<16x32xf32>
    %109 = arith.mulf %107, %108 : vector<16x32xf32>
    %110 = vector.broadcast %89 : vector<1x32xf32> to vector<16x32xf32>
    %111 = arith.addf %109, %110 : vector<16x32xf32>
    %c1 = arith.constant 1 : index
    %c0_44 = arith.constant 0 : index
    %c0_45 = arith.constant 0 : index
    %112 = vector.load %arg6[%c1, %c0_44, %c0_45] : memref<2x32x384xf32, #tpu.memory_space<vmem>>, vector<1x32x384xf32>
    %113 = vector.shape_cast %112 : vector<1x32x384xf32> to vector<32x384xf32>
    %c1_46 = arith.constant 1 : index
    %c0_47 = arith.constant 0 : index
    %c0_48 = arith.constant 0 : index
    %114 = vector.load %arg7[%c1_46, %c0_47, %c0_48] : memref<2x128x32xf32, #tpu.memory_space<vmem>>, vector<1x128x32xf32>
    %115 = vector.shape_cast %114 : vector<1x128x32xf32> to vector<128x32xf32>
    %c1_49 = arith.constant 1 : index
    %c0_50 = arith.constant 0 : index
    %c0_51 = arith.constant 0 : index
    %116 = vector.load %arg8[%c1_49, %c0_50, %c0_51] : memref<2x8x128xf32, #tpu.memory_space<vmem>>, vector<1x8x128xf32>
    %117 = vector.shape_cast %116 : vector<1x8x128xf32> to vector<8x128xf32>
    %118 = vector.extract_strided_slice %113 {offsets = [0, 0], sizes = [32, 128], strides = [1, 1]} : vector<32x384xf32> to vector<32x128xf32>
    %cst_52 = arith.constant dense<0.000000e+00> : vector<16x128xf32>
    %119 = tpu.matmul %111, %118, %cst_52 {dimension_numbers = #tpu.dot_dimension_numbers<[1], [0], [0], [1], [0, 0, 1, 1], [], []>} : vector<16x32xf32>, vector<32x128xf32>, vector<16x128xf32> -> vector<16x128xf32>
    %120 = vector.extract_strided_slice %117 {offsets = [0, 0], sizes = [1, 128], strides = [1, 1]} : vector<8x128xf32> to vector<1x128xf32>
    %121 = vector.broadcast %120 : vector<1x128xf32> to vector<16x128xf32>
    %122 = arith.addf %119, %121 : vector<16x128xf32>
    %123 = vector.extract_strided_slice %122 {offsets = [0, 0], sizes = [16, 32], strides = [1, 1]} : vector<16x128xf32> to vector<16x32xf32>
    %124 = vector.extract_strided_slice %122 {offsets = [0, 32], sizes = [16, 32], strides = [1, 1]} : vector<16x128xf32> to vector<16x32xf32>
    %125 = vector.extract_strided_slice %122 {offsets = [0, 64], sizes = [16, 32], strides = [1, 1]} : vector<16x128xf32> to vector<16x32xf32>
    %126 = tpu.transpose %124, [1, 0] : vector<16x32xf32> -> vector<32x16xf32>
    %cst_53 = arith.constant dense<0.000000e+00> : vector<32x128xf32>
    %127 = tpu.matmul %126, %4, %cst_53 {dimension_numbers = #tpu.dot_dimension_numbers<[1], [0], [0], [1], [0, 0, 1, 1], [], []>} : vector<32x16xf32>, vector<16x128xf32>, vector<32x128xf32> -> vector<32x128xf32>
    %128 = arith.mulf %127, %2 : vector<32x128xf32>
    %cst_54 = arith.constant dense<0.000000e+00> : vector<16x128xf32>
    %129 = tpu.matmul %123, %128, %cst_54 {dimension_numbers = #tpu.dot_dimension_numbers<[1], [0], [0], [1], [0, 0, 1, 1], [], []>} : vector<16x32xf32>, vector<32x128xf32>, vector<16x128xf32> -> vector<16x128xf32>
    %130 = arith.addf %129, %1 : vector<16x128xf32>
    %cst_55 = arith.constant dense<0xFF800000> : vector<16xf32>
    %131 = vector.multi_reduction <maximumf>, %130, %cst_55 [1] : vector<16x128xf32> to vector<16xf32>
    %132 = vector.shape_cast %131 : vector<16xf32> to vector<16x1xf32>
    %133 = vector.broadcast %132 : vector<16x1xf32> to vector<16x128xf32>
    %134 = arith.subf %130, %133 : vector<16x128xf32>
    %135 = math.exp %134 : vector<16x128xf32>
    %cst_56 = arith.constant dense<0.000000e+00> : vector<128x32xf32>
    %136 = tpu.matmul %5, %125, %cst_56 {dimension_numbers = #tpu.dot_dimension_numbers<[1], [0], [0], [1], [0, 0, 1, 1], [], []>} : vector<128x16xf32>, vector<16x32xf32>, vector<128x32xf32> -> vector<128x32xf32>
    %137 = arith.mulf %136, %3 : vector<128x32xf32>
    %cst_57 = arith.constant dense<0.000000e+00> : vector<16x32xf32>
    %138 = tpu.matmul %135, %137, %cst_57 {dimension_numbers = #tpu.dot_dimension_numbers<[1], [0], [0], [1], [0, 0, 1, 1], [], []>} : vector<16x128xf32>, vector<128x32xf32>, vector<16x32xf32> -> vector<16x32xf32>
    %cst_58 = arith.constant dense<0.000000e+00> : vector<16x32xf32>
    %139 = tpu.matmul %135, %3, %cst_58 {dimension_numbers = #tpu.dot_dimension_numbers<[1], [0], [0], [1], [0, 0, 1, 1], [], []>} : vector<16x128xf32>, vector<128x32xf32>, vector<16x32xf32> -> vector<16x32xf32>
    %cst_59 = arith.constant 1.000000e-30 : f32
    %140 = vector.broadcast %cst_59 : f32 to vector<16x32xf32>
    %141 = arith.maximumf %139, %140 : vector<16x32xf32>
    %142 = tpu.reciprocal %141 {approx = true} : vector<16x32xf32> -> vector<16x32xf32>
    %143 = arith.mulf %138, %142 : vector<16x32xf32>
    %144 = vector.extract_strided_slice %113 {offsets = [0, 128], sizes = [32, 32], strides = [1, 1]} : vector<32x384xf32> to vector<32x32xf32>
    %cst_60 = arith.constant dense<0.000000e+00> : vector<16x32xf32>
    %145 = tpu.matmul %143, %144, %cst_60 {dimension_numbers = #tpu.dot_dimension_numbers<[1], [0], [0], [1], [0, 0, 1, 1], [], []>} : vector<16x32xf32>, vector<32x32xf32>, vector<16x32xf32> -> vector<16x32xf32>
    %146 = vector.extract_strided_slice %117 {offsets = [1, 0], sizes = [1, 32], strides = [1, 1]} : vector<8x128xf32> to vector<1x32xf32>
    %147 = vector.broadcast %146 : vector<1x32xf32> to vector<16x32xf32>
    %148 = arith.addf %145, %147 : vector<16x32xf32>
    %149 = arith.addf %111, %148 : vector<16x32xf32>
    %150 = vector.extract_strided_slice %117 {offsets = [4, 0], sizes = [1, 32], strides = [1, 1]} : vector<8x128xf32> to vector<1x32xf32>
    %151 = vector.extract_strided_slice %117 {offsets = [5, 0], sizes = [1, 32], strides = [1, 1]} : vector<8x128xf32> to vector<1x32xf32>
    %cst_61 = arith.constant dense<0.000000e+00> : vector<16xf32>
    %152 = vector.multi_reduction <add>, %149, %cst_61 [1] : vector<16x32xf32> to vector<16xf32>
    %153 = vector.shape_cast %152 : vector<16xf32> to vector<16x1xf32>
    %cst_62 = arith.constant 3.200000e+01 : f32
    %154 = vector.broadcast %cst_62 : f32 to vector<16x1xf32>
    %155 = arith.divf %153, %154 : vector<16x1xf32>
    %156 = vector.broadcast %155 : vector<16x1xf32> to vector<16x32xf32>
    %157 = arith.subf %149, %156 : vector<16x32xf32>
    %158 = arith.mulf %157, %157 : vector<16x32xf32>
    %cst_63 = arith.constant dense<0.000000e+00> : vector<16xf32>
    %159 = vector.multi_reduction <add>, %158, %cst_63 [1] : vector<16x32xf32> to vector<16xf32>
    %160 = vector.shape_cast %159 : vector<16xf32> to vector<16x1xf32>
    %cst_64 = arith.constant 3.200000e+01 : f32
    %161 = vector.broadcast %cst_64 : f32 to vector<16x1xf32>
    %162 = arith.divf %160, %161 : vector<16x1xf32>
    %163 = vector.broadcast %155 : vector<16x1xf32> to vector<16x32xf32>
    %164 = arith.subf %149, %163 : vector<16x32xf32>
    %cst_65 = arith.constant 9.99999996E-13 : f32
    %165 = vector.broadcast %cst_65 : f32 to vector<16x1xf32>
    %166 = arith.addf %162, %165 : vector<16x1xf32>
    %167 = math.rsqrt %166 : vector<16x1xf32>
    %168 = vector.broadcast %167 : vector<16x1xf32> to vector<16x32xf32>
    %169 = arith.mulf %164, %168 : vector<16x32xf32>
    %170 = vector.broadcast %150 : vector<1x32xf32> to vector<16x32xf32>
    %171 = arith.mulf %169, %170 : vector<16x32xf32>
    %172 = vector.broadcast %151 : vector<1x32xf32> to vector<16x32xf32>
    %173 = arith.addf %171, %172 : vector<16x32xf32>
    %174 = vector.extract_strided_slice %113 {offsets = [0, 256], sizes = [32, 128], strides = [1, 1]} : vector<32x384xf32> to vector<32x128xf32>
    %cst_66 = arith.constant dense<0.000000e+00> : vector<16x128xf32>
    %175 = tpu.matmul %173, %174, %cst_66 {dimension_numbers = #tpu.dot_dimension_numbers<[1], [0], [0], [1], [0, 0, 1, 1], [], []>} : vector<16x32xf32>, vector<32x128xf32>, vector<16x128xf32> -> vector<16x128xf32>
    %176 = vector.extract_strided_slice %117 {offsets = [2, 0], sizes = [1, 128], strides = [1, 1]} : vector<8x128xf32> to vector<1x128xf32>
    %177 = vector.broadcast %176 : vector<1x128xf32> to vector<16x128xf32>
    %178 = arith.addf %175, %177 : vector<16x128xf32>
    %cst_67 = arith.constant 5.000000e-01 : f32
    %179 = vector.broadcast %cst_67 : f32 to vector<16x128xf32>
    %180 = arith.mulf %179, %178 : vector<16x128xf32>
    %cst_68 = arith.constant 2.000000e+00 : f32
    %181 = math.sqrt %cst_68 : f32
    %cst_69 = arith.constant 1.000000e+00 : f32
    %182 = arith.divf %cst_69, %181 : f32
    %183 = vector.broadcast %182 : f32 to vector<16x128xf32>
    %184 = arith.mulf %178, %183 : vector<16x128xf32>
    %185 = math.erf %184 : vector<16x128xf32>
    %cst_70 = arith.constant 1.000000e+00 : f32
    %186 = vector.broadcast %cst_70 : f32 to vector<16x128xf32>
    %187 = arith.addf %186, %185 : vector<16x128xf32>
    %188 = arith.mulf %180, %187 : vector<16x128xf32>
    %cst_71 = arith.constant dense<0.000000e+00> : vector<16x32xf32>
    %189 = tpu.matmul %188, %115, %cst_71 {dimension_numbers = #tpu.dot_dimension_numbers<[1], [0], [0], [1], [0, 0, 1, 1], [], []>} : vector<16x128xf32>, vector<128x32xf32>, vector<16x32xf32> -> vector<16x32xf32>
    %190 = vector.extract_strided_slice %117 {offsets = [3, 0], sizes = [1, 32], strides = [1, 1]} : vector<8x128xf32> to vector<1x32xf32>
    %191 = vector.broadcast %190 : vector<1x32xf32> to vector<16x32xf32>
    %192 = arith.addf %189, %191 : vector<16x32xf32>
    %193 = arith.addf %173, %192 : vector<16x32xf32>
    %194 = vector.extract_strided_slice %117 {offsets = [6, 0], sizes = [1, 32], strides = [1, 1]} : vector<8x128xf32> to vector<1x32xf32>
    %195 = vector.extract_strided_slice %117 {offsets = [7, 0], sizes = [1, 32], strides = [1, 1]} : vector<8x128xf32> to vector<1x32xf32>
    %cst_72 = arith.constant dense<0.000000e+00> : vector<16xf32>
    %196 = vector.multi_reduction <add>, %193, %cst_72 [1] : vector<16x32xf32> to vector<16xf32>
    %197 = vector.shape_cast %196 : vector<16xf32> to vector<16x1xf32>
    %cst_73 = arith.constant 3.200000e+01 : f32
    %198 = vector.broadcast %cst_73 : f32 to vector<16x1xf32>
    %199 = arith.divf %197, %198 : vector<16x1xf32>
    %200 = vector.broadcast %199 : vector<16x1xf32> to vector<16x32xf32>
    %201 = arith.subf %193, %200 : vector<16x32xf32>
    %202 = arith.mulf %201, %201 : vector<16x32xf32>
    %cst_74 = arith.constant dense<0.000000e+00> : vector<16xf32>
    %203 = vector.multi_reduction <add>, %202, %cst_74 [1] : vector<16x32xf32> to vector<16xf32>
    %204 = vector.shape_cast %203 : vector<16xf32> to vector<16x1xf32>
    %cst_75 = arith.constant 3.200000e+01 : f32
    %205 = vector.broadcast %cst_75 : f32 to vector<16x1xf32>
    %206 = arith.divf %204, %205 : vector<16x1xf32>
    %207 = vector.broadcast %199 : vector<16x1xf32> to vector<16x32xf32>
    %208 = arith.subf %193, %207 : vector<16x32xf32>
    %cst_76 = arith.constant 9.99999996E-13 : f32
    %209 = vector.broadcast %cst_76 : f32 to vector<16x1xf32>
    %210 = arith.addf %206, %209 : vector<16x1xf32>
    %211 = math.rsqrt %210 : vector<16x1xf32>
    %212 = vector.broadcast %211 : vector<16x1xf32> to vector<16x32xf32>
    %213 = arith.mulf %208, %212 : vector<16x32xf32>
    %214 = vector.broadcast %194 : vector<1x32xf32> to vector<16x32xf32>
    %215 = arith.mulf %213, %214 : vector<16x32xf32>
    %216 = vector.broadcast %195 : vector<1x32xf32> to vector<16x32xf32>
    %217 = arith.addf %215, %216 : vector<16x32xf32>
    %c0_77 = arith.constant 0 : index
    %c0_78 = arith.constant 0 : index
    %218 = vector.load %arg9[%c0_77, %c0_78] : memref<2x16xf32, #tpu.memory_space<vmem>>, vector<2x16xf32>
    %cst_79 = arith.constant dense<0.000000e+00> : vector<2x32xf32>
    %219 = tpu.matmul %218, %217, %cst_79 {dimension_numbers = #tpu.dot_dimension_numbers<[1], [0], [0], [1], [0, 0, 1, 1], [], []>} : vector<2x16xf32>, vector<16x32xf32>, vector<2x32xf32> -> vector<2x32xf32>
    %c0_80 = arith.constant 0 : index
    %c0_81 = arith.constant 0 : index
    %220 = vector.load %arg10[%c0_80, %c0_81] : memref<2x32xf32, #tpu.memory_space<vmem>>, vector<2x32xf32>
    tpu.vector_store %arg10[%c0_80, %c0_81], %219 {strides = array<i32>} : memref<2x32xf32, #tpu.memory_space<vmem>>, vector<2x32xf32>,
    return
  }
}

</mosaic_0001>

<bundles_post_ra>
// kernel: tile.9
= control target key start
LH: loop header
LB: loop body
LE: loop exit
PB: predicated region body
PF: predicated region fallthrough
CT: control target
= control target key end

     0   :  { %vm4_vm0 = vcmask 1047556   ;;  %s209_s14 = smov 96   ;;  %s210_s19 = smov 112   ;;  %vm6_vm1 = vcmask 130048   ;;  %vm25_vm2 = vcmask 1048448   ;;  %vm46_vm3 = vcmask 917248   ;;  %s388_s0 = inlined_call_operand.vmem [shape: f32[16,8,16], index: 0, kind: input, shape index: {}]   ;;  %s389_s1 = inlined_call_operand.vmem [shape: f32[16,128], index: 1, kind: output, shape index: {}]  }
   0x1   :  { %v172_v0 = vld [vmem:[%s388_s0 + $0x6] ss:$8 sm:$0xf]   ;;  %v167_v3 = vld [vmem:[%s388_s0 + $0x7] ss:$8 sm:$0xf]  }
   0x2   :  { %v173_v1 = vld [vmem:[%s388_s0 + $0x6] ss:$8 sm:$0xf0]   ;;  %v168_v4 = vld [vmem:[%s388_s0 + $0x7] ss:$8 sm:$0xf0]  }
   0x3   :  { %v43_v2 = vsel %vm4_vm0, %v173_v1, %v172_v0  ;;  %v22_v5 = vsel %vm4_vm0, %v168_v4, %v167_v3  ;;  %v174_v6 = vld [vmem:[%s388_s0 + $0x46] ss:$8 sm:$0xf]   ;;  %v169_v9 = vld [vmem:[%s388_s0 + $0x47] ss:$8 sm:$0xf]  }
   0x4   :  { %44 = vrot.lane.b32.xlu1 %v43_v2, %s209_s14  ;;  %v175_v7 = vld [vmem:[%s388_s0 + $0x46] ss:$8 sm:$0xf0]   ;;  %23 = vrot.lane.b32.xlu0 %v22_v5, %s210_s19  ;;  %v170_v10 = vld [vmem:[%s388_s0 + $0x47] ss:$8 sm:$0xf0]  }
   0x5   :  { %v53_v8 = vsel %vm4_vm0, %v175_v7, %v174_v6  ;;  %v32_v11 = vsel %vm4_vm0, %v170_v10, %v169_v9  ;;  %v179_v12 = vld [vmem:[%s388_s0 + $0x45] ss:$8 sm:$0xf]   ;;  %v184_v18 = vld [vmem:[%s388_s0 + $0x44] ss:$8 sm:$0xf]  }
   0x6   :  { %v180_v13 = vld [vmem:[%s388_s0 + $0x45] ss:$8 sm:$0xf0]   ;;  %v185_v19 = vld [vmem:[%s388_s0 + $0x44] ss:$8 sm:$0xf0]  }
   0x7   :  { %v177_v14 = vld [vmem:[%s388_s0 + $0x5] ss:$8 sm:$0xf]   ;;  %v74_v16 = vsel %vm4_vm0, %v180_v13, %v179_v12  ;;  %v182_v20 = vld [vmem:[%s388_s0 + $0x4] ss:$8 sm:$0xf]   ;;  %v95_v22 = vsel %vm4_vm0, %v185_v19, %v184_v18 }
   0x8   :  { %54 = vrot.lane.b32.xlu1 %v53_v8, %s209_s14  ;;  %v178_v15 = vld [vmem:[%s388_s0 + $0x5] ss:$8 sm:$0xf0]   ;;  %33 = vrot.lane.b32.xlu0 %v32_v11, %s210_s19  ;;  %v183_v21 = vld [vmem:[%s388_s0 + $0x4] ss:$8 sm:$0xf0]  }
   0x9   :  { %v64_v17 = vsel %vm4_vm0, %v178_v15, %v177_v14  ;;  %s211_s11 = smov 80   ;;  %v85_v23 = vsel %vm4_vm0, %v183_v21, %v182_v20  ;;  %v189_v24 = vld [vmem:[%s388_s0 + $0x43] ss:$8 sm:$0xf]   ;;  %s212_s20 = smov 64   ;;  %vm67_vm4 = vcmask 786048  }
   0xa   :  { %v190_v25 = vld [vmem:[%s388_s0 + $0x43] ss:$8 sm:$0xf0]   ;;  %v194_v28 = vld [vmem:[%s388_s0 + $0x42] ss:$8 sm:$0xf]  }
   0xb   :  { %v187_v26 = vld [vmem:[%s388_s0 + $0x3] ss:$8 sm:$0xf]   ;;  %v195_v29 = vld [vmem:[%s388_s0 + $0x42] ss:$8 sm:$0xf0]   ;;  %v116_v30 = vsel %vm4_vm0, %v190_v25, %v189_v24 }
   0xc   :  { %75 = vrot.lane.b32.xlu1 %v74_v16, %s211_s11  ;;  %65 = vrot.lane.b32.xlu0 %v64_v17, %s211_s11  ;;  %v188_v27 = vld [vmem:[%s388_s0 + $0x3] ss:$8 sm:$0xf0]   ;;  %v192_v31 = vld [vmem:[%s388_s0 + $0x2] ss:$8 sm:$0xf]   ;;  %v137_v40 = vsel %vm4_vm0, %v195_v29, %v194_v28 }
   0xd   :  { %v2_v32 = vld [vmem:[%s388_s0] ss:$8 sm:$0xf]   ;;  %v106_v33 = vsel %vm4_vm0, %v188_v27, %v187_v26  ;;  %v193_v36 = vld [vmem:[%s388_s0 + $0x2] ss:$8 sm:$0xf0]  }
   0xe   :  { %v3_v34 = vld [vmem:[%s388_s0] ss:$8 sm:$0xf0]   ;;  %s213_s8 = smov 48   ;;  %v127_v41 = vsel %vm4_vm0, %v193_v36, %v192_v31  ;;  %s215_s21 = smov 16   ;;  %vm88_vm5 = vcmask 654848  }
   0xf   :  { %v164_v35 = vld [vmem:[%s388_s0 + $0x40] ss:$8 sm:$0xf]   ;;  %v5_v37 = vsel %vm4_vm0, %v3_v34, %v2_v32  ;;  %v199_v42 = vld [vmem:[%s388_s0 + $0x41] ss:$8 sm:$0xf]  }
  0x10   :  { %96 = vrot.lane.b32.xlu1 %v95_v22, %s212_s20  ;;  %86 = vrot.lane.b32.xlu0 %v85_v23, %s212_s20  ;;  %v165_v38 = vld [vmem:[%s388_s0 + $0x40] ss:$8 sm:$0xf0]   ;;  %7 = vst.msk [vmem:[%s389_s1] sm:$0xff] %vm6_vm1, %v5_v37   ;;  %vm109_vm6 = vcmask 523648   ;;  %vm130_vm7 = vcmask 392448  }
  0x11   :  { %v13_v39 = vsel %vm4_vm0, %v165_v38, %v164_v35  ;;  %v200_v43 = vld [vmem:[%s388_s0 + $0x41] ss:$8 sm:$0xf0]   ;;  %vm151_vm8 = vcmask 261248  }
  0x12   :  { %166 = vst.msk [vmem:[%s389_s1 + $0x8] sm:$0xff] %vm6_vm1, %v13_v39   ;;  %v197_v44 = vld [vmem:[%s388_s0 + $0x1] ss:$8 sm:$0xf]   ;;  %v158_v46 = vsel %vm4_vm0, %v200_v43, %v199_v42 }
  0x13   :  { %v198_v45 = vld [vmem:[%s388_s0 + $0x1] ss:$8 sm:$0xf0]   ;;  %s214_s0 = smov 32  }
  0x14   :  { %117 = vrot.lane.b32.xlu1 %v116_v30, %s213_s8  ;;  %107 = vrot.lane.b32.xlu0 %v106_v33, %s213_s8  ;;  %v148_v47 = vsel %vm4_vm0, %v198_v45, %v197_v44 }
  0x18   :  { %138 = vrot.lane.b32.xlu1 %v137_v40, %s214_s0  ;;  %128 = vrot.lane.b32.xlu0 %v127_v41, %s214_s0 }
  0x1c   :  { %159 = vrot.lane.b32.xlu1 %v158_v46, %s215_s21  ;;  %149 = vrot.lane.b32.xlu0 %v148_v47, %s215_s21 }
  0x76   :  { %v45_v48 = vpop.permute.xlu1 %44   ;;  %v24_v49 = vpop.permute.xlu0 %23  }
  0x77   :  { %26 = vst.msk [vmem:[%s389_s1] sm:$0xff] %vm25_vm2, %v24_v49  }
  0x78   :  { %47 = vst.msk [vmem:[%s389_s1] sm:$0xff] %vm46_vm3, %v45_v48  }
  0x7a   :  { %v55_v50 = vpop.permute.xlu1 %54   ;;  %v34_v51 = vpop.permute.xlu0 %33  }
  0x7b   :  { %171 = vst.msk [vmem:[%s389_s1 + $0x8] sm:$0xff] %vm25_vm2, %v34_v51  }
  0x7c   :  { %176 = vst.msk [vmem:[%s389_s1 + $0x8] sm:$0xff] %vm46_vm3, %v55_v50  }
  0x7e   :  { %v76_v52 = vpop.permute.xlu1 %75   ;;  %v66_v53 = vpop.permute.xlu0 %65  }
  0x7f   :  { %181 = vst.msk [vmem:[%s389_s1 + $0x8] sm:$0xff] %vm67_vm4, %v76_v52   ;;  %68 = vst.msk [vmem:[%s389_s1] sm:$0xff] %vm67_vm4, %v66_v53  }
  0x82   :  { %v97_v54 = vpop.permute.xlu1 %96   ;;  %v87_v55 = vpop.permute.xlu0 %86  }
  0x83   :  { %186 = vst.msk [vmem:[%s389_s1 + $0x8] sm:$0xff] %vm88_vm5, %v97_v54   ;;  %89 = vst.msk [vmem:[%s389_s1] sm:$0xff] %vm88_vm5, %v87_v55  }
  0x86   :  { %v118_v56 = vpop.permute.xlu1 %117   ;;  %v108_v57 = vpop.permute.xlu0 %107  }
  0x87   :  { %191 = vst.msk [vmem:[%s389_s1 + $0x8] sm:$0xff] %vm109_vm6, %v118_v56   ;;  %110 = vst.msk [vmem:[%s389_s1] sm:$0xff] %vm109_vm6, %v108_v57  }
  0x8a   :  { %v139_v58 = vpop.permute.xlu1 %138   ;;  %v129_v59 = vpop.permute.xlu0 %128  }
  0x8b   :  { %196 = vst.msk [vmem:[%s389_s1 + $0x8] sm:$0xff] %vm130_vm7, %v139_v58   ;;  %131 = vst.msk [vmem:[%s389_s1] sm:$0xff] %vm130_vm7, %v129_v59  }
  0x8e   :  { %v160_v60 = vpop.permute.xlu1 %159   ;;  %v150_v61 = vpop.permute.xlu0 %149  }
  0x8f   :  { %201 = vst.msk [vmem:[%s389_s1 + $0x8] sm:$0xff] %vm151_vm8, %v160_v60   ;;  %152 = vst.msk [vmem:[%s389_s1] sm:$0xff] %vm151_vm8, %v150_v61  }

// kernel: bert_sentence_encoder_forward.1
= control target key start
LH: loop header
LB: loop body
LE: loop exit
PB: predicated region body
PF: predicated region fallthrough
CT: control target
= control target key end

     0   :  { %vm111_vm0 = vcmask 261120   ;;  %s3760_s0 = inlined_call_operand.vmem [shape: f32[16,32], index: 0, kind: input, shape index: {}]   ;;  %s3761_s1 = inlined_call_operand.vmem [shape: f32[16,128], index: 1, kind: input, shape index: {}]   ;;  %s3762_s2 = inlined_call_operand.vmem [shape: f32[32,128], index: 2, kind: input, shape index: {}]   ;;  %s3763_s3 = inlined_call_operand.vmem [shape: f32[128,32], index: 3, kind: input, shape index: {}]   ;;  %s3764_s4 = inlined_call_operand.vmem [shape: f32[16,128], index: 4, kind: input, shape index: {}]   ;;  %s3765_s5 = inlined_call_operand.vmem [shape: f32[128,16], index: 5, kind: input, shape index: {}]   ;;  %s3766_s6 = inlined_call_operand.vmem [shape: f32[2,32,384], index: 6, kind: input, shape index: {}]   ;;  %s3767_s7 = inlined_call_operand.vmem [shape: f32[2,128,32], index: 7, kind: input, shape index: {}]   ;;  %s3768_s8 = inlined_call_operand.vmem [shape: f32[2,8,128], index: 8, kind: input, shape index: {}]   ;;  %s3769_s9 = inlined_call_operand.vmem [shape: f32[2,16], index: 9, kind: input, shape index: {}]   ;;  %s3770_s10 = inlined_call_operand.hbm [shape: f32[2,32], index: 10, kind: output, shape index: {}]  }
   0x1   :  { %v87_v0 = vld [vmem:[%s3766_s6 + $0x48] sm:$0xff]  ;;  %v84_v1 = vld [vmem:[%s3766_s6 + $0x30] sm:$0xff]  ;;  %v3044_v2 = vld [vmem:[%s3760_s0] sm:$0xff] }
   0x2   :  { %2527 = vmatprep.subr.mxu0 %v87_v0  ;;  %v81_v3 = vld [vmem:[%s3766_s6 + $0x18] sm:$0xff]  ;;  %2535 = vmatprep.mubr.msk.f32.mxu0 %vm111_vm0, %v3044_v2 }
   0x3   :  { %2528 = vmatpush3.msra.mxu0 %v87_v0 }
   0x4   :  { %15 = vsyncpa [#allocation3], 0  ;;  %2529 = vmatprep.subr.mxu0 %v84_v1  ;;  %v78_v4 = vld [vmem:[%s3766_s6] sm:$0xff]  ;;  %v3057_v5 = vld [vmem:[%s3760_s0 + $0x8] sm:$0xff]  ;;  %v107_v6 = vlaneseq  ;;  %s2975_s0 = smov 96   ;;  %s2976_s27 = smov 64  }
   0x5   :  { %2530 = vmatpush3.msra.mxu0 %v84_v1  ;;  %v3067_v9 = vld [vmem:[%s3768_s8] sm:$0xff]  ;;  %v3079_v15 = vld [vmem:[%s3764_s4 + $0x8] sm:$0xff]  ;;  %vm233_vm1 = vcmask 130048   ;;  %v3098_v25 = vld [vmem:[%s3762_s2 + $0x18] sm:$0xff]  ;;  %vm2978_vm2 = vmmov 0   ;;  %s2979_s23 = smov [#allocation2]  }
   0x6   :  { %2531 = vmatprep.subr.mxu0 %v81_v3  ;;  %v3061_v7 = vshrl.u32 %v107_v6, 7  ;;  %2538 = vmatprep.subr.mxu1 %v3079_v15  ;;  %v3085_v16 = vld [vmem:[%s3764_s4] sm:$0xff]  ;;  %v3103_v27 = vld [vmem:[%s3762_s2 + $0x10] sm:$0xff]  ;;  %v3109_v29 = vld [vmem:[%s3762_s2 + $0x8] sm:$0xff]  ;;  %vm2218_vm3 = vcmask 254976  }
   0x7   :  { %2532 = vmatpush3.msra.mxu0 %v81_v3  ;;  %2539 = vmatpush3.msra.mxu1 %v3079_v15  ;;  %v3115_v32 = vld [vmem:[%s3762_s2] sm:$0xff]  ;;  %v3130_v38 = vld [vmem:[%s3765_s5 + $0x8] sm:$0xff]  ;;  %v3135_v39 = vld [vmem:[%s3765_s5 + $0x10] sm:$0xff] }
   0x8   :  { %2533 = vmatprep.subr.mxu0 %v78_v4  ;;  %v3771_v8 = vsub.s32 0, %v3061_v7  ;;  %2540 = vmatprep.subr.mxu1 %v3085_v16  ;;  %v3122_v35 = vld [vmem:[%s3765_s5] sm:$0xff]  ;;  %v3144_v40 = vld [vmem:[%s3765_s5 + $0x18] sm:$0xff]  ;;  %v3158_v42 = vld [vmem:[%s3765_s5 + $0x28] sm:$0xff] }
   0x9   :  { %2534 = vmatpush3.msra.mxu0 %v78_v4  ;;  %2541 = vmatpush3.msra.mxu1 %v3085_v16  ;;  %v3149_v41 = vld [vmem:[%s3765_s5 + $0x20] sm:$0xff]  ;;  %v3163_v43 = vld [vmem:[%s3765_s5 + $0x30] sm:$0xff]  ;;  %v3172_v44 = vld [vmem:[%s3765_s5 + $0x38] sm:$0xff] }
   0xa   :  { %2536 = vmatmul.mubr.msk.f32.vlgmr.msra.gmra.mxu0 %vm111_vm0, %v3057_v5  ;;  %v110_v11 = vrot.slane %v3067_v9, %v3771_v8  ;;  %v3177_v45 = vld [vmem:[%s3765_s5 + $0x40] sm:$0xff]  ;;  %v3186_v46 = vld [vmem:[%s3765_s5 + $0x48] sm:$0xff]  ;;  %v3191_v47 = vld [vmem:[%s3765_s5 + $0x50] sm:$0xff] }
   0xb   :  { %v3200_v48 = vld [vmem:[%s3765_s5 + $0x58] sm:$0xff]  ;;  %v3205_v49 = vld [vmem:[%s3765_s5 + $0x60] sm:$0xff]  ;;  %v3214_v50 = vld [vmem:[%s3765_s5 + $0x68] sm:$0xff] }
   0xc   :  { %v3219_v51 = vld [vmem:[%s3765_s5 + $0x70] sm:$0xff]  ;;  %v3228_v52 = vld [vmem:[%s3765_s5 + $0x78] sm:$0xff]  ;;  %v3248_v55 = vld [vmem:[%s3763_s3 + $0x68] sm:$0xff] }
   0xd   :  { %3776 = vst [vmem:[#allocation5_spill] sm:$0xff] %v3219_v51  ;;  %3777 = vst [vmem:[#allocation6_spill] sm:$0xff] %v3228_v52  ;;  %v3235_v53 = vld [vmem:[%s3763_s3 + $0x78] sm:$0xff]  ;;  %v3241_v54 = vld [vmem:[%s3763_s3 + $0x70] sm:$0xff] }
   0xe   :  { %2622 = vmatprep.subr.mxu1 %v3235_v53  ;;  %v3255_v56 = vld [vmem:[%s3763_s3 + $0x60] sm:$0xff]  ;;  %v3262_v57 = vld [vmem:[%s3763_s3 + $0x58] sm:$0xff]  ;;  %v3269_v58 = vld [vmem:[%s3763_s3 + $0x50] sm:$0xff] }
   0xf   :  { %v3276_v59 = vld [vmem:[%s3763_s3 + $0x48] sm:$0xff]  ;;  %v3283_v60 = vld [vmem:[%s3763_s3 + $0x40] sm:$0xff]  ;;  %v3290_v61 = vld [vmem:[%s3763_s3 + $0x38] sm:$0xff] }
  0x10   :  { %v3297_v62 = vld [vmem:[%s3763_s3 + $0x30] sm:$0xff]  ;;  %v3304_v63 = vld [vmem:[%s3763_s3 + $0x28] sm:$0xff]  ;;  %v3311_v0 = vld [vmem:[%s3763_s3 + $0x20] sm:$0xff] }
  0x11   :  { %v3318_v1 = vld [vmem:[%s3763_s3 + $0x18] sm:$0xff]  ;;  %v3325_v3 = vld [vmem:[%s3763_s3 + $0x10] sm:$0xff]  ;;  %v3332_v4 = vld [vmem:[%s3763_s3 + $0x8] sm:$0xff] }
  0x12   :  { %v3339_v6 = vld [vmem:[%s3763_s3] sm:$0xff] }
  0xca   :  { %v2537_v10 = vpop.f32.mrf.mxu0 }
  0xcb   :  { %v190_v14 = vadd.f32 %v2537_v10, %v110_v11 }
  0xcc   :  { %v184_v12 = vpop.f32.mrf.mxu0 }
  0xcd   :  { %v185_v13 = vadd.f32 %v184_v12, %v110_v11  ;;  %v3347_v11 = vld [vmem:[%s3761_s1] sm:$0xff] }
  0xce   :  { %3778 = vst [vmem:[#allocation7_spill] sm:$0xff] %v3347_v11 }
  0xcf   :  { %195 = vrot.lane.b32.xlu0 %v185_v13, %s2975_s0  ;;  %2556 = vmatprep.mubr.msk.f32.mxu0 %vm111_vm0, %v185_v13 }
  0xd3   :  { %197 = vrot.lane.b32.xlu0 %v190_v14, %s2975_s0 }
  0xd7   :  { %426 = vrot.lane.b32.xlu0 %v190_v14, %s2976_s27 }
 0x141   :  { %v196_v17 = vpop.permute.xlu0 %195 }
 0x142   :  { %201 = vxpose.xlu1.b32.start [1/2] (short) (narrow) %v196_v17, 32 }
 0x145   :  { %v198_v18 = vpop.permute.xlu0 %197 }
 0x146   :  { %202 = vxpose.xlu1.b32.end [2/2] (short) (narrow) %v198_v18, 32 }
 0x149   :  { %v427_v36 = vpop.permute.xlu0 %426 }
 0x16c   :  { %424 = vrot.lane.b32.xlu1 %v185_v13, %s2976_s27 }
 0x1be   :  { %v217_v19 = vpop.trf.xlu1 }
 0x1bf   :  { %2542 = vmatprep.mubr.msk.f32.mxu1 %vm233_vm1, %v217_v19 }
 0x1c2   :  { %v218_v20 = vpop.trf.xlu1 }
 0x1c3   :  { %2543 = vmatmul.mubr.msk.f32.vlgmr.msra.gmra.mxu1 %vm233_vm1, %v218_v20 }
 0x1c4   :  { %2623 = vmatpush3.msra.mxu1 %v3235_v53 }
 0x1c5   :  { %2624 = vmatprep.subr.mxu1 %v3241_v54 }
 0x1c6   :  { %v219_v21 = vpop.trf.xlu1  ;;  %2625 = vmatpush3.msra.mxu1 %v3241_v54 }
 0x1c7   :  { %2545 = vmatprep.mubr.msk.f32.mxu1 %vm233_vm1, %v219_v21  ;;  %2626 = vmatprep.subr.mxu1 %v3248_v55 }
 0x1c8   :  { %2627 = vmatpush3.msra.mxu1 %v3248_v55 }
 0x1c9   :  { %2628 = vmatprep.subr.mxu1 %v3255_v56 }
 0x1ca   :  { %v220_v22 = vpop.trf.xlu1  ;;  %2629 = vmatpush3.msra.mxu1 %v3255_v56 }
 0x1cb   :  { %2546 = vmatmul.mubr.msk.f32.gmra.mxu1 %vm233_vm1, %v220_v22  ;;  %2630 = vmatprep.subr.mxu1 %v3262_v57 }
 0x1cc   :  { %2631 = vmatpush3.msra.mxu1 %v3262_v57 }
 0x1cd   :  { %2632 = vmatprep.subr.mxu1 %v3269_v58 }
 0x1ce   :  { %2633 = vmatpush3.msra.mxu1 %v3269_v58 }
 0x1cf   :  { %2634 = vmatprep.subr.mxu1 %v3276_v59 }
 0x1d0   :  { %2635 = vmatpush3.msra.mxu1 %v3276_v59 }
 0x1d1   :  { %2636 = vmatprep.subr.mxu1 %v3283_v60 }
 0x1d2   :  { %2637 = vmatpush3.msra.mxu1 %v3283_v60 }
 0x1d3   :  { %2638 = vmatprep.subr.mxu1 %v3290_v61 }
 0x1d4   :  { %2639 = vmatpush3.msra.mxu1 %v3290_v61 }
 0x1d5   :  { %2640 = vmatprep.subr.mxu1 %v3297_v62 }
 0x1d6   :  { %2641 = vmatpush3.msra.mxu1 %v3297_v62 }
 0x1d7   :  { %2642 = vmatprep.subr.mxu1 %v3304_v63 }
 0x1d8   :  { %2643 = vmatpush3.msra.mxu1 %v3304_v63 }
 0x1d9   :  { %2644 = vmatprep.subr.mxu1 %v3311_v0 }
 0x1da   :  { %2645 = vmatpush3.msra.mxu1 %v3311_v0 }
 0x1db   :  { %2646 = vmatprep.subr.mxu1 %v3318_v1 }
 0x1dc   :  { %2647 = vmatpush3.msra.mxu1 %v3318_v1 }
 0x1dd   :  { %2648 = vmatprep.subr.mxu1 %v3325_v3 }
 0x1de   :  { %v425_v37 = vpop.permute.xlu1 %424  ;;  %2649 = vmatpush3.msra.mxu1 %v3325_v3 }
 0x1df   :  { %2650 = vmatprep.subr.mxu1 %v3332_v4 }
 0x1e0   :  { %2651 = vmatpush3.msra.mxu1 %v3332_v4 }
 0x1e1   :  { %2652 = vmatprep.subr.mxu1 %v3339_v6 }
 0x1e2   :  { %2653 = vmatpush3.msra.mxu1 %v3339_v6 }
 0x283   :  { %v2544_v23 = vpop.f32.mrf.mxu1 }
 0x284   :  { %v332_v33 = vmul.f32 %v2544_v23, %v3109_v29 }
 0x285   :  { %v312_v24 = vpop.f32.mrf.mxu1 }
 0x286   :  { %v331_v34 = vmul.f32 %v312_v24, %v3115_v32 }
 0x28b   :  { %v2547_v26 = vpop.f32.mrf.mxu1 }
 0x28c   :  { %v334_v28 = vmul.f32 %v2547_v26, %v3098_v25 }
 0x28d   :  { %v322_v30 = vpop.f32.mrf.mxu1 }
 0x28e   :  { %v333_v31 = vmul.f32 %v322_v30, %v3103_v27  ;;  %2548 = vmatprep.subr.mxu0 %v334_v28 }
 0x28f   :  { %2549 = vmatpush3.msra.mxu0 %v334_v28 }
 0x290   :  { %2550 = vmatprep.subr.mxu0 %v333_v31 }
 0x291   :  { %2551 = vmatpush3.msra.mxu0 %v333_v31 }
 0x292   :  { %2552 = vmatprep.subr.mxu0 %v332_v33 }
 0x293   :  { %2553 = vmatpush3.msra.mxu0 %v332_v33 }
 0x294   :  { %2554 = vmatprep.subr.mxu0 %v331_v34 }
 0x295   :  { %2555 = vmatpush3.msra.mxu0 %v331_v34 }
 0x296   :  { %2557 = vmatmul.mubr.msk.f32.vlgmr.msra.gmra.mxu0 %vm111_vm0, %v190_v14  ;;  %2559 = vmatprep.subr.mxu0 %v427_v36  ;;  %v3355_v14 = vld [vmem:[%s3761_s1 + $0x8] sm:$0xff] }
 0x297   :  { %2560 = vmatpush3.msra.mxu0 %v427_v36  ;;  %2563 = vmatprep.mubr.msk.f32.mxu0 %vm233_vm1, %v3122_v35  ;;  %3779 = vst [vmem:[#allocation8_spill] sm:$0xff] %v3355_v14 }
 0x298   :  { %2561 = vmatprep.subr.mxu0 %v425_v37 }
 0x299   :  { %2562 = vmatpush3.msra.mxu0 %v425_v37 }
 0x29a   :  { %2564 = vmatmul.mubr.msk.f32.vlgmr.msra.gmra.mxu0 %vm233_vm1, %v3130_v38 }
 0x29b   :  { %2566 = vmatprep.mubr.msk.f32.mxu0 %vm233_vm1, %v3135_v39 }
 0x29e   :  { %2567 = vmatmul.mubr.msk.f32.gmra.mxu0 %vm233_vm1, %v3144_v40 }
 0x29f   :  { %2569 = vmatprep.mubr.msk.f32.mxu0 %vm233_vm1, %v3149_v41 }
 0x2a2   :  { %2570 = vmatmul.mubr.msk.f32.gmra.mxu0 %vm233_vm1, %v3158_v42 }
 0x2a3   :  { %2572 = vmatprep.mubr.msk.f32.mxu0 %vm233_vm1, %v3163_v43 }
 0x2a6   :  { %2573 = vmatmul.mubr.msk.f32.gmra.mxu0 %vm233_vm1, %v3172_v44 }
 0x2a7   :  { %2575 = vmatprep.mubr.msk.f32.mxu0 %vm233_vm1, %v3177_v45 }
 0x2aa   :  { %2576 = vmatmul.mubr.msk.f32.gmra.mxu0 %vm233_vm1, %v3186_v46 }
 0x2ab   :  { %2578 = vmatprep.mubr.msk.f32.mxu0 %vm233_vm1, %v3191_v47 }
 0x2ae   :  { %2579 = vmatmul.mubr.msk.f32.gmra.mxu0 %vm233_vm1, %v3200_v48 }
 0x2af   :  { %2581 = vmatprep.mubr.msk.f32.mxu0 %vm233_vm1, %v3205_v49 }
 0x2b2   :  { %2582 = vmatmul.mubr.msk.f32.gmra.mxu0 %vm233_vm1, %v3214_v50 }
 0x2b3   :  { %2584 = vmatprep.mubr.msk.f32.mxu0 %vm233_vm1, %v3219_v51 }
 0x2b6   :  { %2585 = vmatmul.mubr.msk.f32.gmra.mxu0 %vm233_vm1, %v3228_v52 }
 0x356   :  { %v2558_v10 = vpop.f32.mrf.mxu0 }
 0x357   :  { %v3359_v19 = vadd.f32 %v2558_v10, %v3355_v14 }
 0x358   :  { %v405_v12 = vpop.f32.mrf.mxu0 }
 0x359   :  { %v3350_v13 = vadd.f32 %v405_v12, %v3347_v11 }
 0x35a   :  { %v2565_v17 = vpop.f32.mrf.mxu0 }
 0x35b   :  { %414 = vmax.xlane.f32.xlu0 %v3350_v13 }
 0x35c   :  { %v544_v18 = vpop.f32.mrf.mxu0 }
 0x35e   :  { %v2568_v20 = vpop.f32.mrf.mxu0 }
 0x35f   :  { %416 = vmax.xlane.f32.xlu0 %v3359_v19 }
 0x360   :  { %v554_v21 = vpop.f32.mrf.mxu0 }
 0x362   :  { %v2571_v22 = vpop.f32.mrf.mxu0 }
 0x364   :  { %v564_v23 = vpop.f32.mrf.mxu0 }
 0x366   :  { %v2574_v24 = vpop.f32.mrf.mxu0 }
 0x368   :  { %v574_v26 = vpop.f32.mrf.mxu0 }
 0x36a   :  { %v2577_v28 = vpop.f32.mrf.mxu0 }
 0x36c   :  { %v584_v30 = vpop.f32.mrf.mxu0 }
 0x36e   :  { %v2580_v31 = vpop.f32.mrf.mxu0 }
 0x36f   :  { %v634_v52 = vmul.f32 %v2580_v31, %v3262_v57  ;;  %v628_v31 = vmul.f32 %v2571_v22, %v3304_v63  ;;  %v623_v22 = vmul.f32 %v544_v18, %v3339_v6 }
 0x370   :  { %v594_v33 = vpop.f32.mrf.mxu0 }
 0x371   :  { %v633_v51 = vmul.f32 %v594_v33, %v3269_v58  ;;  %v88_v33 = vld [vmem:[%s3766_s6 + $0x50] sm:$0xff] }
 0x372   :  { %v2583_v34 = vpop.f32.mrf.mxu0 }
 0x373   :  { %v636_v10 = vmul.f32 %v2583_v34, %v3248_v55  ;;  %v630_v34 = vmul.f32 %v2574_v24, %v3290_v61  ;;  %v624_v24 = vmul.f32 %v2565_v17, %v3332_v4 }
 0x374   :  { %v604_v36 = vpop.f32.mrf.mxu0 }
 0x375   :  { %v635_v14 = vmul.f32 %v604_v36, %v3255_v56  ;;  %v79_v36 = vld [vmem:[%s3766_s6 + $0x8] sm:$0xff] }
 0x376   :  { %v2586_v37 = vpop.f32.mrf.mxu0 }
 0x377   :  { %v638_v12 = vmul.f32 %v2586_v37, %v3235_v53  ;;  %v632_v37 = vmul.f32 %v2577_v28, %v3276_v59 }
 0x378   :  { %v614_v8 = vpop.f32.mrf.mxu0 }
 0x379   :  { %v637_v11 = vmul.f32 %v614_v8, %v3241_v54  ;;  %2587 = vmatprep.subr.mxu0 %v638_v12  ;;  %v631_v8 = vmul.f32 %v584_v30, %v3283_v60 }
 0x37a   :  { %2588 = vmatpush3.msra.mxu0 %v638_v12 }
 0x37b   :  { %2589 = vmatprep.subr.mxu0 %v637_v11 }
 0x37c   :  { %2590 = vmatpush3.msra.mxu0 %v637_v11  ;;  %v629_v11 = vmul.f32 %v574_v26, %v3297_v62 }
 0x37d   :  { %2591 = vmatprep.subr.mxu0 %v636_v10 }
 0x37e   :  { %2592 = vmatpush3.msra.mxu0 %v636_v10 }
 0x37f   :  { %2593 = vmatprep.subr.mxu0 %v635_v14 }
 0x380   :  { %2594 = vmatpush3.msra.mxu0 %v635_v14  ;;  %v627_v14 = vmul.f32 %v564_v23, %v3311_v0 }
 0x381   :  { %2595 = vmatprep.subr.mxu0 %v634_v52 }
 0x382   :  { %2596 = vmatpush3.msra.mxu0 %v634_v52  ;;  %v626_v52 = vmul.f32 %v2568_v20, %v3318_v1 }
 0x383   :  { %2597 = vmatprep.subr.mxu0 %v633_v51 }
 0x384   :  { %2598 = vmatpush3.msra.mxu0 %v633_v51  ;;  %v625_v51 = vmul.f32 %v554_v21, %v3325_v3 }
 0x385   :  { %2599 = vmatprep.subr.mxu0 %v632_v37 }
 0x386   :  { %2600 = vmatpush3.msra.mxu0 %v632_v37 }
 0x387   :  { %2601 = vmatprep.subr.mxu0 %v631_v8 }
 0x388   :  { %2602 = vmatpush3.msra.mxu0 %v631_v8 }
 0x389   :  { %2603 = vmatprep.subr.mxu0 %v630_v34 }
 0x38a   :  { %2604 = vmatpush3.msra.mxu0 %v630_v34 }
 0x38b   :  { %2605 = vmatprep.subr.mxu0 %v629_v11 }
 0x38c   :  { %2606 = vmatpush3.msra.mxu0 %v629_v11 }
 0x38d   :  { %2607 = vmatprep.subr.mxu0 %v628_v31 }
 0x38e   :  { %2608 = vmatpush3.msra.mxu0 %v628_v31 }
 0x38f   :  { %2609 = vmatprep.subr.mxu0 %v627_v14 }
 0x390   :  { %2610 = vmatpush3.msra.mxu0 %v627_v14 }
 0x391   :  { %2611 = vmatprep.subr.mxu0 %v626_v52 }
 0x392   :  { %2612 = vmatpush3.msra.mxu0 %v626_v52 }
 0x393   :  { %2613 = vmatprep.subr.mxu0 %v625_v51 }
 0x394   :  { %2614 = vmatpush3.msra.mxu0 %v625_v51 }
 0x395   :  { %2615 = vmatprep.subr.mxu0 %v624_v24 }
 0x396   :  { %2616 = vmatpush3.msra.mxu0 %v624_v24  ;;  %v797_v24 = vsub.s32 1, %v3061_v7 }
 0x397   :  { %2617 = vmatprep.subr.mxu0 %v623_v22 }
 0x398   :  { %2618 = vmatpush3.msra.mxu0 %v623_v22  ;;  %v798_v22 = vrot.slane %v3067_v9, %v797_v24 }
 0x399   :  { %2657 = vmatprep.subr.mxu0 %v88_v33 }
 0x3e4   :  { %v415_v23 = vpop.xlane.xlu0 %414 }
 0x3e5   :  { %v418_v20 = vsub.f32 %v3350_v13, %v415_v23  ;;  %v85_v13 = vld [vmem:[%s3766_s6 + $0x38] sm:$0xff] }
 0x3e7   :  { %v420_v26 = vmul.f32 1.442695, %v418_v20 }
 0x3e8   :  { %v417_v28 = vpop.xlane.xlu0 %416 }
 0x3e9   :  { %2913 = vpow2.f32 %v420_v26  ;;  %v419_v21 = vsub.f32 %v3359_v19, %v417_v28  ;;  %v82_v19 = vld [vmem:[%s3766_s6 + $0x20] sm:$0xff] }
 0x3eb   :  { %v422_v30 = vmul.f32 1.442695, %v419_v21 }
 0x3ed   :  { %2915 = vpow2.f32 %v422_v30 }
 0x3f6   :  { %v2914_v17 = vpop.eup %2913 }
 0x3f7   :  { %2619 = vmatprep.mubr.f32.mxu0 %v2914_v17  ;;  %2654 = vmatprep.mubr.f32.mxu1 %v2914_v17 }
 0x3fa   :  { %v2916_v18 = vpop.eup %2915 }
 0x3fb   :  { %2620 = vmatmul.mubr.f32.vlgmr.msra.gmra.mxu0 %v2916_v18  ;;  %2655 = vmatmul.mubr.f32.vlgmr.msra.gmra.mxu1 %v2916_v18 }
 0x3fc   :  { %2658 = vmatpush3.msra.mxu0 %v88_v33 }
 0x3fd   :  { %2659 = vmatprep.subr.mxu0 %v85_v13 }
 0x3fe   :  { %2660 = vmatpush3.msra.mxu0 %v85_v13 }
 0x3ff   :  { %2661 = vmatprep.subr.mxu0 %v82_v19 }
 0x400   :  { %2662 = vmatpush3.msra.mxu0 %v82_v19 }
 0x401   :  { %2663 = vmatprep.subr.mxu0 %v79_v36 }
 0x402   :  { %2664 = vmatpush3.msra.mxu0 %v79_v36 }
 0x4bb   :  { %v2656_v12 = vpop.f32.mrf.mxu1  ;;  %v2621_v34 = vpop.f32.mrf.mxu0 }
 0x4bc   :  { %v790_v10 = vmax.f32 %v2656_v12, 1e-30 }
 0x4bd   :  { %v780_v37 = vpop.f32.mrf.mxu1  ;;  %v705_v14 = vpop.f32.mrf.mxu0 }
 0x4be   :  { %v789_v8 = vmax.f32 %v780_v37, 1e-30  ;;  %2917 = vrcp.f32 %v790_v10 }
 0x4c0   :  { %2919 = vrcp.f32 %v789_v8 }
 0x4cb   :  { %v2918_v11 = vpop.eup %2917 }
 0x4cc   :  { %v794_v51 = vmul.f32 %v2918_v11, %v2621_v34  ;;  %v86_v11 = vld [vmem:[%s3766_s6 + $0x40] sm:$0xff] }
 0x4cd   :  { %v2920_v31 = vpop.eup %2919 }
 0x4ce   :  { %v793_v52 = vmul.f32 %v2920_v31, %v705_v14  ;;  %v83_v31 = vld [vmem:[%s3766_s6 + $0x28] sm:$0xff]  ;;  %v80_v14 = vld [vmem:[%s3766_s6 + $0x10] sm:$0xff] }
 0x4d0   :  { %2665 = vmatprep.mubr.msk.f32.mxu0 %vm111_vm0, %v793_v52  ;;  %v105_v52 = vld [vmem:[%s3767_s7 + $0x78] sm:$0xff] }
 0x4d1   :  { %2666 = vmatmul.mubr.msk.f32.vlgmr.msra.gmra.mxu0 %vm111_vm0, %v794_v51  ;;  %v104_v51 = vld [vmem:[%s3767_s7 + $0x70] sm:$0xff]  ;;  %2679 = vmatprep.subr.mxu0 %v105_v52 }
 0x4d2   :  { %2680 = vmatpush3.msra.mxu0 %v105_v52  ;;  %v98_v52 = vld [vmem:[%s3767_s7 + $0x40] sm:$0xff] }
 0x4d3   :  { %2681 = vmatprep.subr.mxu0 %v104_v51 }
 0x4d4   :  { %2682 = vmatpush3.msra.mxu0 %v104_v51  ;;  %v97_v51 = vld [vmem:[%s3767_s7 + $0x38] sm:$0xff] }
 0x591   :  { %v2667_v23 = vpop.f32.mrf.mxu0 }
 0x592   :  { %v877_v20 = vadd.f32 %v2667_v23, %v798_v22 }
 0x593   :  { %v871_v26 = vpop.f32.mrf.mxu0 }
 0x594   :  { %v872_v28 = vadd.f32 %v871_v26, %v798_v22  ;;  %v881_v21 = vadd.f32 %v877_v20, %v3057_v5  ;;  %v103_v22 = vld [vmem:[%s3767_s7 + $0x68] sm:$0xff] }
 0x595   :  { %2683 = vmatprep.subr.mxu0 %v103_v22 }
 0x596   :  { %v885_v30 = vsel %vm111_vm0, %v881_v21, 0.0  ;;  %v880_v17 = vadd.f32 %v872_v28, %v3044_v2  ;;  %v89_v2 = vld [vmem:[%s3766_s6 + $0x58] sm:$0xff]  ;;  %2684 = vmatpush3.msra.mxu0 %v103_v22  ;;  %v96_v22 = vld [vmem:[%s3767_s7 + $0x30] sm:$0xff] }
 0x597   :  { %886 = vadd.xlane.f32.xlu0 %v885_v30  ;;  %2668 = vmatprep.subr.mxu1 %v89_v2 }
 0x598   :  { %v882_v18 = vsel %vm111_vm0, %v880_v17, 0.0  ;;  %2669 = vmatpush3.msra.mxu1 %v89_v2 }
 0x599   :  { %883 = vadd.xlane.f32.xlu1 %v882_v18  ;;  %2670 = vmatprep.subr.mxu1 %v86_v11  ;;  %v917_v18 = vsub.s32 5, %v3061_v7 }
 0x59a   :  { %2671 = vmatpush3.msra.mxu1 %v86_v11 }
 0x59b   :  { %2672 = vmatprep.subr.mxu1 %v83_v31 }
 0x59c   :  { %2673 = vmatpush3.msra.mxu1 %v83_v31  ;;  %v100_v31 = vld [vmem:[%s3767_s7 + $0x50] sm:$0xff] }
 0x59d   :  { %2674 = vmatprep.subr.mxu1 %v80_v14 }
 0x59e   :  { %2675 = vmatpush3.msra.mxu1 %v80_v14  ;;  %v99_v14 = vld [vmem:[%s3767_s7 + $0x48] sm:$0xff] }
 0x620   :  { %v887_v33 = vpop.xlane.xlu0 %886 }
 0x621   :  { %v890_v13 = vmul.f32 0.03125, %v887_v33 }
 0x622   :  { %v884_v19 = vpop.xlane.xlu1 %883 }
 0x623   :  { %v889_v36 = vmul.f32 0.03125, %v884_v19  ;;  %v892_v12 = vsub.f32 %v881_v21, %v890_v13 }
 0x625   :  { %v891_v10 = vsub.f32 %v880_v17, %v889_v36  ;;  %v894_v34 = vmul.f32 %v892_v12, %v892_v12  ;;  %v911_v17 = vsub.s32 4, %v3061_v7  ;;  %v918_v36 = vrot.slane %v3067_v9, %v917_v18 }
 0x627   :  { %v893_v37 = vmul.f32 %v891_v10, %v891_v10  ;;  %v898_v5 = vsel %vm111_vm0, %v894_v34, 0.0  ;;  %v912_v33 = vrot.slane %v3067_v9, %v911_v17 }
 0x629   :  { %v895_v8 = vsel %vm111_vm0, %v893_v37, 0.0 }
 0x62a   :  { %896 = vadd.xlane.f32.xlu0 %v895_v8 }
 0x62e   :  { %899 = vadd.xlane.f32.xlu0 %v898_v5 }
 0x6b3   :  { %v897_v23 = vpop.xlane.xlu0 %896 }
 0x6b4   :  { %v901_v20 = vmul.f32 0.03125, %v897_v23  ;;  %v95_v23 = vld [vmem:[%s3767_s7 + $0x28] sm:$0xff] }
 0x6b6   :  { %v903_v26 = vadd.f32 1e-12, %v901_v20  ;;  %v94_v20 = vld [vmem:[%s3767_s7 + $0x20] sm:$0xff] }
 0x6b7   :  { %v900_v28 = vpop.xlane.xlu0 %899 }
 0x6b8   :  { %2921 = vrsqrt.f32 %v903_v26  ;;  %v902_v21 = vmul.f32 0.03125, %v900_v28  ;;  %v93_v26 = vld [vmem:[%s3767_s7 + $0x18] sm:$0xff]  ;;  %v92_v28 = vld [vmem:[%s3767_s7 + $0x10] sm:$0xff] }
 0x6ba   :  { %v904_v30 = vadd.f32 1e-12, %v902_v21  ;;  %v91_v21 = vld [vmem:[%s3767_s7 + $0x8] sm:$0xff] }
 0x6bc   :  { %2923 = vrsqrt.f32 %v904_v30  ;;  %v90_v30 = vld [vmem:[%s3767_s7] sm:$0xff] }
 0x6c5   :  { %v2922_v13 = vpop.eup %2921 }
 0x6c6   :  { %v907_v19 = vmul.f32 %v2922_v13, %v891_v10  ;;  %v102_v10 = vld [vmem:[%s3767_s7 + $0x60] sm:$0xff] }
 0x6c7   :  { %2685 = vmatprep.subr.mxu0 %v102_v10 }
 0x6c8   :  { %v913_v37 = vmul.f32 %v912_v33, %v907_v19  ;;  %2686 = vmatpush3.msra.mxu0 %v102_v10 }
 0x6c9   :  { %v2924_v8 = vpop.eup %2923 }
 0x6ca   :  { %v908_v34 = vmul.f32 %v2924_v8, %v892_v12  ;;  %v3433_v5 = vadd.f32 %v918_v36, %v913_v37  ;;  %v101_v12 = vld [vmem:[%s3767_s7 + $0x58] sm:$0xff] }
 0x6cb   :  { %2687 = vmatprep.subr.mxu0 %v101_v12 }
 0x6cc   :  { %v914_v2 = vmul.f32 %v912_v33, %v908_v34  ;;  %2676 = vmatprep.mubr.msk.f32.mxu1 %vm111_vm0, %v3433_v5  ;;  %2688 = vmatpush3.msra.mxu0 %v101_v12  ;;  %v923_v33 = vsub.s32 2, %v3061_v7 }
 0x6cd   :  { %2689 = vmatprep.subr.mxu0 %v100_v31 }
 0x6ce   :  { %v3437_v11 = vadd.f32 %v918_v36, %v914_v2  ;;  %2690 = vmatpush3.msra.mxu0 %v100_v31  ;;  %v924_v13 = vrot.slane %v3067_v9, %v923_v33 }
 0x6cf   :  { %2691 = vmatprep.subr.mxu0 %v99_v14 }
 0x6d0   :  { %2677 = vmatmul.mubr.msk.f32.vlgmr.msra.gmra.mxu1 %vm111_vm0, %v3437_v11  ;;  %2692 = vmatpush3.msra.mxu0 %v99_v14 }
 0x6d1   :  { %2693 = vmatprep.subr.mxu0 %v98_v52 }
 0x6d2   :  { %2694 = vmatpush3.msra.mxu0 %v98_v52 }
 0x6d3   :  { %2695 = vmatprep.subr.mxu0 %v97_v51 }
 0x6d4   :  { %2696 = vmatpush3.msra.mxu0 %v97_v51 }
 0x6d5   :  { %2697 = vmatprep.subr.mxu0 %v96_v22 }
 0x6d6   :  { %2698 = vmatpush3.msra.mxu0 %v96_v22 }
 0x6d7   :  { %2699 = vmatprep.subr.mxu0 %v95_v23 }
 0x6d8   :  { %2700 = vmatpush3.msra.mxu0 %v95_v23 }
 0x6d9   :  { %2701 = vmatprep.subr.mxu0 %v94_v20 }
 0x6da   :  { %2702 = vmatpush3.msra.mxu0 %v94_v20  ;;  %v1018_v20 = vsub.s32 3, %v3061_v7 }
 0x6db   :  { %2703 = vmatprep.subr.mxu0 %v93_v26 }
 0x6dc   :  { %2704 = vmatpush3.msra.mxu0 %v93_v26  ;;  %v1019_v26 = vrot.slane %v3067_v9, %v1018_v20 }
 0x6dd   :  { %2705 = vmatprep.subr.mxu0 %v92_v28 }
 0x6de   :  { %2706 = vmatpush3.msra.mxu0 %v92_v28 }
 0x6df   :  { %2707 = vmatprep.subr.mxu0 %v91_v21 }
 0x6e0   :  { %2708 = vmatpush3.msra.mxu0 %v91_v21 }
 0x6e1   :  { %2709 = vmatprep.subr.mxu0 %v90_v30 }
 0x6e2   :  { %2710 = vmatpush3.msra.mxu0 %v90_v30 }
 0x6e3   :  { %2809 = vmatprep.subr.mxu0 %v3235_v53 }
 0x790   :  { %v2678_v19 = vpop.f32.mrf.mxu1 }
 0x791   :  { %v1003_v36 = vadd.f32 %v2678_v19, %v924_v13 }
 0x792   :  { %v997_v37 = vpop.f32.mrf.mxu1 }
 0x793   :  { %v1009_v8 = vmul.f32 0.70710677, %v1003_v36  ;;  %v998_v34 = vadd.f32 %v997_v37, %v924_v13  ;;  %v1007_v51 = vmul.f32 0.5, %v1003_v36 }
 0x795   :  { %2925 = verf.f32 %v1009_v8  ;;  %v1008_v2 = vmul.f32 0.70710677, %v998_v34  ;;  %v1006_v14 = vmul.f32 0.5, %v998_v34 }
 0x797   :  { %2927 = verf.f32 %v1008_v2 }
 0x7a2   :  { %v2926_v10 = vpop.eup %2925 }
 0x7a3   :  { %v1013_v31 = vadd.f32 1.0, %v2926_v10 }
 0x7a4   :  { %v2928_v12 = vpop.eup %2927 }
 0x7a5   :  { %v1012_v52 = vadd.f32 1.0, %v2928_v12  ;;  %v1015_v23 = vmul.f32 %v1013_v31, %v1007_v51 }
 0x7a7   :  { %v1014_v22 = vmul.f32 %v1012_v52, %v1006_v14 }
 0x7a9   :  { %2711 = vmatprep.mubr.f32.mxu0 %v1014_v22 }
 0x7aa   :  { %2712 = vmatmul.mubr.f32.vlgmr.msra.gmra.mxu0 %v1015_v23  ;;  %v2268_v23 = vld [vmem:[%s3766_s6 + $0x90] sm:$0xff] }
 0x7ab   :  { %2810 = vmatpush3.msra.mxu0 %v3235_v53 }
 0x7ac   :  { %2811 = vmatprep.subr.mxu0 %v3241_v54 }
 0x7ad   :  { %2812 = vmatpush3.msra.mxu0 %v3241_v54 }
 0x7ae   :  { %2813 = vmatprep.subr.mxu0 %v3248_v55 }
 0x7af   :  { %2814 = vmatpush3.msra.mxu0 %v3248_v55 }
 0x7b0   :  { %2815 = vmatprep.subr.mxu0 %v3255_v56 }
 0x7b1   :  { %2816 = vmatpush3.msra.mxu0 %v3255_v56 }
 0x7b2   :  { %2817 = vmatprep.subr.mxu0 %v3262_v57 }
 0x7b3   :  { %2818 = vmatpush3.msra.mxu0 %v3262_v57 }
 0x7b4   :  { %2819 = vmatprep.subr.mxu0 %v3269_v58 }
 0x7b5   :  { %2820 = vmatpush3.msra.mxu0 %v3269_v58 }
 0x7b6   :  { %2821 = vmatprep.subr.mxu0 %v3276_v59 }
 0x7b7   :  { %2822 = vmatpush3.msra.mxu0 %v3276_v59 }
 0x7b8   :  { %2823 = vmatprep.subr.mxu0 %v3283_v60 }
 0x7b9   :  { %2824 = vmatpush3.msra.mxu0 %v3283_v60 }
 0x7ba   :  { %2825 = vmatprep.subr.mxu0 %v3290_v61 }
 0x7bb   :  { %2826 = vmatpush3.msra.mxu0 %v3290_v61 }
 0x7bc   :  { %2827 = vmatprep.subr.mxu0 %v3297_v62 }
 0x7bd   :  { %2828 = vmatpush3.msra.mxu0 %v3297_v62 }
 0x7be   :  { %2829 = vmatprep.subr.mxu0 %v3304_v63 }
 0x7bf   :  { %2830 = vmatpush3.msra.mxu0 %v3304_v63 }
 0x7c0   :  { %2831 = vmatprep.subr.mxu0 %v3311_v0 }
 0x7c1   :  { %2832 = vmatpush3.msra.mxu0 %v3311_v0 }
 0x7c2   :  { %2833 = vmatprep.subr.mxu0 %v3318_v1 }
 0x7c3   :  { %2834 = vmatpush3.msra.mxu0 %v3318_v1 }
 0x7c4   :  { %2835 = vmatprep.subr.mxu0 %v3325_v3 }
 0x7c5   :  { %2836 = vmatpush3.msra.mxu0 %v3325_v3 }
 0x7c6   :  { %2837 = vmatprep.subr.mxu0 %v3332_v4 }
 0x7c7   :  { %2838 = vmatpush3.msra.mxu0 %v3332_v4 }
 0x7c8   :  { %2839 = vmatprep.subr.mxu0 %v3339_v6 }
 0x7c9   :  { %2840 = vmatpush3.msra.mxu0 %v3339_v6 }
 0x86a   :  { %v2713_v28 = vpop.f32.mrf.mxu0 }
 0x86b   :  { %v1092_v30 = vadd.f32 %v2713_v28, %v1019_v26  ;;  %v2262_v28 = vld [vmem:[%s3766_s6 + $0x60] sm:$0xff] }
 0x86c   :  { %v1086_v21 = vpop.f32.mrf.mxu0 }
 0x86d   :  { %v1087_v13 = vadd.f32 %v1086_v21, %v1019_v26  ;;  %v1096_v37 = vadd.f32 %v1092_v30, %v3437_v11  ;;  %v2271_v11 = vld [vmem:[%s3766_s6 + $0xa8] sm:$0xff]  ;;  %v2265_v26 = vld [vmem:[%s3766_s6 + $0x78] sm:$0xff] }
 0x86e   :  { %2714 = vmatprep.subr.mxu1 %v2271_v11 }
 0x86f   :  { %v1095_v19 = vadd.f32 %v1087_v13, %v3433_v5  ;;  %v1100_v8 = vsel %vm111_vm0, %v1096_v37, 0.0  ;;  %2715 = vmatpush3.msra.mxu1 %v2271_v11 }
 0x870   :  { %2716 = vmatprep.subr.mxu1 %v2268_v23 }
 0x871   :  { %v1097_v36 = vsel %vm111_vm0, %v1095_v19, 0.0  ;;  %2717 = vmatpush3.msra.mxu1 %v2268_v23 }
 0x872   :  { %1098 = vadd.xlane.f32.xlu0 %v1097_v36  ;;  %2718 = vmatprep.subr.mxu1 %v2265_v26 }
 0x873   :  { %2719 = vmatpush3.msra.mxu1 %v2265_v26 }
 0x874   :  { %2720 = vmatprep.subr.mxu1 %v2262_v28 }
 0x875   :  { %2721 = vmatpush3.msra.mxu1 %v2262_v28 }
 0x876   :  { %1101 = vadd.xlane.f32.xlu0 %v1100_v8  ;;  %2725 = vmatprep.subr.mxu1 %v3079_v15  ;;  %v1125_v8 = vsub.s32 6, %v3061_v7 }
 0x8fb   :  { %v1099_v34 = vpop.xlane.xlu0 %1098 }
 0x8fc   :  { %v1103_v2 = vmul.f32 0.03125, %v1099_v34  ;;  %v1131_v34 = vsub.s32 7, %v3061_v7 }
 0x8fe   :  { %v1105_v10 = vsub.f32 %v1095_v19, %v1103_v2  ;;  %v1126_v2 = vrot.slane %v3067_v9, %v1125_v8 }
 0x8ff   :  { %v1102_v12 = vpop.xlane.xlu0 %1101 }
 0x900   :  { %v1104_v31 = vmul.f32 0.03125, %v1102_v12  ;;  %v1107_v14 = vmul.f32 %v1105_v10, %v1105_v10 }
 0x902   :  { %v1106_v52 = vsub.f32 %v1096_v37, %v1104_v31  ;;  %v1109_v51 = vsel %vm111_vm0, %v1107_v14, 0.0  ;;  %v1132_v14 = vrot.slane %v3067_v9, %v1131_v34  ;;  %v3561_v9 = vld [vmem:[%s3768_s8 + $0x8] sm:$0xff] }
 0x903   :  { %1110 = vadd.xlane.f32.xlu0 %v1109_v51 }
 0x904   :  { %v1108_v22 = vmul.f32 %v1106_v52, %v1106_v52 }
 0x906   :  { %v1112_v5 = vsel %vm111_vm0, %v1108_v22, 0.0 }
 0x907   :  { %1113 = vadd.xlane.f32.xlu0 %v1112_v5 }
 0x98c   :  { %v1111_v21 = vpop.xlane.xlu0 %1110 }
 0x98d   :  { %v1115_v30 = vmul.f32 0.03125, %v1111_v21 }
 0x98f   :  { %v1117_v13 = vadd.f32 1e-12, %v1115_v30 }
 0x990   :  { %v1114_v19 = vpop.xlane.xlu0 %1113 }
 0x991   :  { %2929 = vrsqrt.f32 %v1117_v13  ;;  %v1116_v36 = vmul.f32 0.03125, %v1114_v19 }
 0x993   :  { %v1118_v37 = vadd.f32 1e-12, %v1116_v36 }
 0x995   :  { %2931 = vrsqrt.f32 %v1118_v37 }
 0x99e   :  { %v2930_v12 = vpop.eup %2929 }
 0x99f   :  { %v1121_v31 = vmul.f32 %v2930_v12, %v1105_v10  ;;  %v3780_v10 = vsub.s32 0, %v3061_v7 }
 0x9a1   :  { %v1127_v51 = vmul.f32 %v1126_v2, %v1121_v31 }
 0x9a2   :  { %v2932_v22 = vpop.eup %2931 }
 0x9a3   :  { %v1122_v5 = vmul.f32 %v2932_v22, %v1106_v52  ;;  %v3547_v11 = vadd.f32 %v1132_v14, %v1127_v51  ;;  %v1170_v52 = vrot.slane %v3561_v9, %v3780_v10 }
 0x9a5   :  { %v1128_v23 = vmul.f32 %v1126_v2, %v1122_v5  ;;  %2722 = vmatprep.mubr.msk.f32.mxu1 %vm111_vm0, %v3547_v11 }
 0x9a7   :  { %v3551_v26 = vadd.f32 %v1132_v14, %v1128_v23 }
 0x9a9   :  { %2723 = vmatmul.mubr.msk.f32.vlgmr.msra.gmra.mxu1 %vm111_vm0, %v3551_v26 }
 0x9aa   :  { %2726 = vmatpush3.msra.mxu1 %v3079_v15 }
 0x9ab   :  { %2727 = vmatprep.subr.mxu1 %v3085_v16 }
 0x9ac   :  { %2728 = vmatpush3.msra.mxu1 %v3085_v16 }
 0xa69   :  { %v2724_v28 = vpop.f32.mrf.mxu1 }
 0xa6a   :  { %v1249_v21 = vadd.f32 %v2724_v28, %v1170_v52 }
 0xa6b   :  { %v1243_v30 = vpop.f32.mrf.mxu1 }
 0xa6c   :  { %v1244_v13 = vadd.f32 %v1243_v30, %v1170_v52  ;;  %1256 = vrot.lane.b32.xlu1 %v1249_v21, %s2975_s0 }
 0xa6e   :  { %1254 = vrot.lane.b32.xlu0 %v1244_v13, %s2975_s0 }
 0xa70   :  { %1484 = vrot.lane.b32.xlu1 %v1249_v21, %s2976_s27 }
 0xa74   :  { %1482 = vrot.lane.b32.xlu1 %v1244_v13, %s2976_s27 }
 0xade   :  { %v1257_v16 = vpop.permute.xlu1 %1256 }
 0xae0   :  { %v1255_v15 = vpop.permute.xlu0 %1254 }
 0xae1   :  { %1260 = vxpose.xlu0.b32.start [1/2] (short) (narrow) %v1255_v15, 32 }
 0xae2   :  { %v1485_v10 = vpop.permute.xlu1 %1484 }
 0xae5   :  { %1261 = vxpose.xlu0.b32.end [2/2] (short) (narrow) %v1257_v16, 32 }
 0xb5d   :  { %v1276_v19 = vpop.trf.xlu0 }
 0xb5e   :  { %2729 = vmatprep.mubr.msk.f32.mxu1 %vm233_vm1, %v1276_v19 }
 0xb61   :  { %v1277_v36 = vpop.trf.xlu0 }
 0xb62   :  { %2730 = vmatmul.mubr.msk.f32.vlgmr.msra.gmra.mxu1 %vm233_vm1, %v1277_v36 }
 0xb65   :  { %v1278_v37 = vpop.trf.xlu0 }
 0xb66   :  { %2732 = vmatprep.mubr.msk.f32.mxu1 %vm233_vm1, %v1278_v37 }
 0xb69   :  { %v1279_v2 = vpop.trf.xlu0 }
 0xb6a   :  { %2733 = vmatmul.mubr.msk.f32.gmra.mxu1 %vm233_vm1, %v1279_v2 }
 0xb6b   :  { %2743 = vmatprep.mubr.msk.f32.mxu1 %vm111_vm0, %v1244_v13 }
 0xc22   :  { %v2731_v12 = vpop.f32.mrf.mxu1 }
 0xc23   :  { %v1390_v23 = vmul.f32 %v2731_v12, %v3109_v29  ;;  %v3782_v29 = vld [vmem:[#allocation6_spill] sm:$0xff] }
 0xc24   :  { %v1370_v31 = vpop.f32.mrf.mxu1 }
 0xc25   :  { %v1389_v52 = vmul.f32 %v1370_v31, %v3115_v32 }
 0xc2a   :  { %v2734_v14 = vpop.f32.mrf.mxu1 }
 0xc2b   :  { %v1392_v51 = vmul.f32 %v2734_v14, %v3098_v25  ;;  %v1483_v25 = vpop.permute.xlu1 %1482 }
 0xc2c   :  { %v1380_v22 = vpop.f32.mrf.mxu1 }
 0xc2d   :  { %v1391_v5 = vmul.f32 %v1380_v22, %v3103_v27  ;;  %2735 = vmatprep.subr.mxu1 %v1392_v51  ;;  %v3781_v27 = vld [vmem:[#allocation5_spill] sm:$0xff] }
 0xc2e   :  { %2736 = vmatpush3.msra.mxu1 %v1392_v51 }
 0xc2f   :  { %2737 = vmatprep.subr.mxu1 %v1391_v5 }
 0xc30   :  { %2738 = vmatpush3.msra.mxu1 %v1391_v5 }
 0xc31   :  { %2739 = vmatprep.subr.mxu1 %v1390_v23 }
 0xc32   :  { %2740 = vmatpush3.msra.mxu1 %v1390_v23  ;;  %v2269_v23 = vld [vmem:[%s3766_s6 + $0x98] sm:$0xff] }
 0xc33   :  { %2741 = vmatprep.subr.mxu1 %v1389_v52 }
 0xc34   :  { %2742 = vmatpush3.msra.mxu1 %v1389_v52  ;;  %v2263_v52 = vld [vmem:[%s3766_s6 + $0x68] sm:$0xff] }
 0xc35   :  { %2744 = vmatmul.mubr.msk.f32.vlgmr.msra.gmra.mxu1 %vm111_vm0, %v1249_v21  ;;  %2746 = vmatprep.subr.mxu1 %v1485_v10 }
 0xc36   :  { %2747 = vmatpush3.msra.mxu1 %v1485_v10  ;;  %2750 = vmatprep.mubr.msk.f32.mxu1 %vm233_vm1, %v3122_v35  ;;  %v3783_v35 = vld [vmem:[#allocation8_spill] sm:$0xff] }
 0xc37   :  { %2748 = vmatprep.subr.mxu1 %v1483_v25  ;;  %v2266_v10 = vld [vmem:[%s3766_s6 + $0x80] sm:$0xff] }
 0xc38   :  { %2749 = vmatpush3.msra.mxu1 %v1483_v25 }
 0xc39   :  { %2751 = vmatmul.mubr.msk.f32.vlgmr.msra.gmra.mxu1 %vm233_vm1, %v3130_v38 }
 0xc3a   :  { %2753 = vmatprep.mubr.msk.f32.mxu1 %vm233_vm1, %v3135_v39 }
 0xc3d   :  { %2754 = vmatmul.mubr.msk.f32.gmra.mxu1 %vm233_vm1, %v3144_v40  ;;  %v3784_v40 = vld [vmem:[#allocation7_spill] sm:$0xff] }
 0xc3e   :  { %2756 = vmatprep.mubr.msk.f32.mxu1 %vm233_vm1, %v3149_v41 }
 0xc41   :  { %2757 = vmatmul.mubr.msk.f32.gmra.mxu1 %vm233_vm1, %v3158_v42 }
 0xc42   :  { %2759 = vmatprep.mubr.msk.f32.mxu1 %vm233_vm1, %v3163_v43 }
 0xc45   :  { %2760 = vmatmul.mubr.msk.f32.gmra.mxu1 %vm233_vm1, %v3172_v44 }
 0xc46   :  { %2762 = vmatprep.mubr.msk.f32.mxu1 %vm233_vm1, %v3177_v45 }
 0xc49   :  { %2763 = vmatmul.mubr.msk.f32.gmra.mxu1 %vm233_vm1, %v3186_v46 }
 0xc4a   :  { %2765 = vmatprep.mubr.msk.f32.mxu1 %vm233_vm1, %v3191_v47 }
 0xc4d   :  { %2766 = vmatmul.mubr.msk.f32.gmra.mxu1 %vm233_vm1, %v3200_v48 }
 0xc4e   :  { %2768 = vmatprep.mubr.msk.f32.mxu1 %vm233_vm1, %v3205_v49 }
 0xc51   :  { %2769 = vmatmul.mubr.msk.f32.gmra.mxu1 %vm233_vm1, %v3214_v50 }
 0xc52   :  { %2771 = vmatprep.mubr.msk.f32.mxu1 %vm233_vm1, %v3781_v27 }
 0xc55   :  { %2772 = vmatmul.mubr.msk.f32.gmra.mxu1 %vm233_vm1, %v3782_v29 }
 0xcf5   :  { %v2745_v32 = vpop.f32.mrf.mxu1 }
 0xcf6   :  { %v3613_v38 = vadd.f32 %v2745_v32, %v3783_v35 }
 0xcf7   :  { %v1463_v39 = vpop.f32.mrf.mxu1 }
 0xcf8   :  { %v3616_v41 = vadd.f32 %v1463_v39, %v3784_v40  ;;  %1474 = vmax.xlane.f32.xlu0 %v3613_v38 }
 0xcf9   :  { %v2752_v42 = vpop.f32.mrf.mxu1 }
 0xcfa   :  { %1472 = vmax.xlane.f32.xlu1 %v3616_v41 }
 0xcfb   :  { %v1554_v43 = vpop.f32.mrf.mxu1 }
 0xcfd   :  { %v2755_v44 = vpop.f32.mrf.mxu1 }
 0xcff   :  { %v1564_v45 = vpop.f32.mrf.mxu1 }
 0xd01   :  { %v2758_v46 = vpop.f32.mrf.mxu1 }
 0xd03   :  { %v1574_v47 = vpop.f32.mrf.mxu1 }
 0xd05   :  { %v2761_v48 = vpop.f32.mrf.mxu1 }
 0xd07   :  { %v1584_v49 = vpop.f32.mrf.mxu1 }
 0xd09   :  { %v2764_v50 = vpop.f32.mrf.mxu1 }
 0xd0b   :  { %v1594_v28 = vpop.f32.mrf.mxu1 }
 0xd0d   :  { %v2767_v21 = vpop.f32.mrf.mxu1 }
 0xd0e   :  { %v1644_v31 = vmul.f32 %v2767_v21, %v3262_v57  ;;  %v1638_v57 = vmul.f32 %v2758_v46, %v3304_v63 }
 0xd0f   :  { %v1604_v30 = vpop.f32.mrf.mxu1 }
 0xd10   :  { %v1643_v14 = vmul.f32 %v1604_v30, %v3269_v58  ;;  %v1637_v58 = vmul.f32 %v1574_v47, %v3311_v0 }
 0xd11   :  { %v2770_v13 = vpop.f32.mrf.mxu1 }
 0xd12   :  { %v1646_v37 = vmul.f32 %v2770_v13, %v3248_v55  ;;  %v1640_v55 = vmul.f32 %v2761_v48, %v3290_v61  ;;  %v1634_v61 = vmul.f32 %v2752_v42, %v3332_v4 }
 0xd13   :  { %v1614_v15 = vpop.f32.mrf.mxu1 }
 0xd14   :  { %v1645_v12 = vmul.f32 %v1614_v15, %v3255_v56  ;;  %v1639_v56 = vmul.f32 %v1584_v49, %v3297_v62  ;;  %v1633_v62 = vmul.f32 %v1554_v43, %v3339_v6  ;;  %v2272_v6 = vld [vmem:[%s3766_s6 + $0xb0] sm:$0xff]  ;;  %v1808_v43 = vrot.slane %v3561_v9, %v797_v24 }
 0xd15   :  { %v2773_v16 = vpop.f32.mrf.mxu1 }
 0xd16   :  { %v1648_v19 = vmul.f32 %v2773_v16, %v3235_v53  ;;  %v1642_v53 = vmul.f32 %v2764_v50, %v3276_v59  ;;  %v1636_v59 = vmul.f32 %v2755_v44, %v3318_v1 }
 0xd17   :  { %v1624_v36 = vpop.f32.mrf.mxu1 }
 0xd18   :  { %v1647_v2 = vmul.f32 %v1624_v36, %v3241_v54  ;;  %2774 = vmatprep.subr.mxu1 %v1648_v19  ;;  %v1641_v54 = vmul.f32 %v1594_v28, %v3283_v60  ;;  %v1635_v60 = vmul.f32 %v1564_v45, %v3325_v3 }
 0xd19   :  { %2775 = vmatpush3.msra.mxu1 %v1648_v19 }
 0xd1a   :  { %2776 = vmatprep.subr.mxu1 %v1647_v2 }
 0xd1b   :  { %2777 = vmatpush3.msra.mxu1 %v1647_v2  ;;  %v2270_v2 = vld [vmem:[%s3766_s6 + $0xa0] sm:$0xff] }
 0xd1c   :  { %2778 = vmatprep.subr.mxu1 %v1646_v37 }
 0xd1d   :  { %2779 = vmatpush3.msra.mxu1 %v1646_v37 }
 0xd1e   :  { %2780 = vmatprep.subr.mxu1 %v1645_v12 }
 0xd1f   :  { %2781 = vmatpush3.msra.mxu1 %v1645_v12  ;;  %v2267_v12 = vld [vmem:[%s3766_s6 + $0x88] sm:$0xff] }
 0xd20   :  { %2782 = vmatprep.subr.mxu1 %v1644_v31 }
 0xd21   :  { %2783 = vmatpush3.msra.mxu1 %v1644_v31  ;;  %v2264_v31 = vld [vmem:[%s3766_s6 + $0x70] sm:$0xff] }
 0xd22   :  { %2784 = vmatprep.subr.mxu1 %v1643_v14 }
 0xd23   :  { %2785 = vmatpush3.msra.mxu1 %v1643_v14  ;;  %v2289_v14 = vld [vmem:[%s3767_s7 + $0xf8] sm:$0xff] }
 0xd24   :  { %2786 = vmatprep.subr.mxu1 %v1642_v53 }
 0xd25   :  { %2787 = vmatpush3.msra.mxu1 %v1642_v53  ;;  %v2288_v53 = vld [vmem:[%s3767_s7 + $0xf0] sm:$0xff] }
 0xd26   :  { %2788 = vmatprep.subr.mxu1 %v1641_v54 }
 0xd27   :  { %2789 = vmatpush3.msra.mxu1 %v1641_v54  ;;  %v2287_v54 = vld [vmem:[%s3767_s7 + $0xe8] sm:$0xff] }
 0xd28   :  { %2790 = vmatprep.subr.mxu1 %v1640_v55 }
 0xd29   :  { %2791 = vmatpush3.msra.mxu1 %v1640_v55 }
 0xd2a   :  { %2792 = vmatprep.subr.mxu1 %v1639_v56 }
 0xd2b   :  { %2793 = vmatpush3.msra.mxu1 %v1639_v56 }
 0xd2c   :  { %2794 = vmatprep.subr.mxu1 %v1638_v57 }
 0xd2d   :  { %2795 = vmatpush3.msra.mxu1 %v1638_v57 }
 0xd2e   :  { %2796 = vmatprep.subr.mxu1 %v1637_v58 }
 0xd2f   :  { %2797 = vmatpush3.msra.mxu1 %v1637_v58 }
 0xd30   :  { %2798 = vmatprep.subr.mxu1 %v1636_v59 }
 0xd31   :  { %2799 = vmatpush3.msra.mxu1 %v1636_v59 }
 0xd32   :  { %2800 = vmatprep.subr.mxu1 %v1635_v60 }
 0xd33   :  { %2801 = vmatpush3.msra.mxu1 %v1635_v60 }
 0xd34   :  { %2802 = vmatprep.subr.mxu1 %v1634_v61 }
 0xd35   :  { %2803 = vmatpush3.msra.mxu1 %v1634_v61  ;;  %v1921_v61 = vrot.slane %v3561_v9, %v911_v17  ;;  %v2286_v17 = vld [vmem:[%s3767_s7 + $0xe0] sm:$0xff] }
 0xd36   :  { %2804 = vmatprep.subr.mxu1 %v1633_v62 }
 0xd37   :  { %2805 = vmatpush3.msra.mxu1 %v1633_v62 }
 0xd38   :  { %2844 = vmatprep.subr.mxu1 %v2272_v6 }
 0xd81   :  { %v1475_v63 = vpop.xlane.xlu0 %1474 }
 0xd82   :  { %v1477_v0 = vsub.f32 %v3613_v38, %v1475_v63 }
 0xd83   :  { %v1473_v1 = vpop.xlane.xlu1 %1472 }
 0xd84   :  { %v1476_v3 = vsub.f32 %v3616_v41, %v1473_v1  ;;  %v1480_v51 = vmul.f32 1.442695, %v1477_v0  ;;  %v1927_v0 = vrot.slane %v3561_v9, %v917_v18  ;;  %v2285_v18 = vld [vmem:[%s3767_s7 + $0xd8] sm:$0xff] }
 0xd86   :  { %v1478_v22 = vmul.f32 1.442695, %v1476_v3 }
 0xd88   :  { %2933 = vpow2.f32 %v1478_v22 }
 0xd89   :  { %2935 = vpow2.f32 %v1480_v51 }
 0xd95   :  { %v2934_v4 = vpop.eup %2933 }
 0xd96   :  { %v2936_v5 = vpop.eup %2935  ;;  %2806 = vmatprep.mubr.f32.mxu1 %v2934_v4  ;;  %2841 = vmatprep.mubr.f32.mxu0 %v2934_v4 }
 0xd97   :  { %2807 = vmatmul.mubr.f32.vlgmr.msra.gmra.mxu1 %v2936_v5  ;;  %2842 = vmatmul.mubr.f32.vlgmr.msra.gmra.mxu0 %v2936_v5 }
 0xd98   :  { %2845 = vmatpush3.msra.mxu1 %v2272_v6  ;;  %v2284_v6 = vld [vmem:[%s3767_s7 + $0xd0] sm:$0xff] }
 0xd99   :  { %2846 = vmatprep.subr.mxu1 %v2269_v23 }
 0xd9a   :  { %2847 = vmatpush3.msra.mxu1 %v2269_v23  ;;  %v2283_v23 = vld [vmem:[%s3767_s7 + $0xc8] sm:$0xff] }
 0xd9b   :  { %2848 = vmatprep.subr.mxu1 %v2266_v10 }
 0xd9c   :  { %2849 = vmatpush3.msra.mxu1 %v2266_v10  ;;  %v2282_v10 = vld [vmem:[%s3767_s7 + $0xc0] sm:$0xff] }
 0xd9d   :  { %2850 = vmatprep.subr.mxu1 %v2263_v52 }
 0xd9e   :  { %2851 = vmatpush3.msra.mxu1 %v2263_v52  ;;  %v2281_v52 = vld [vmem:[%s3767_s7 + $0xb8] sm:$0xff] }
 0xd9f   :  { %2866 = vmatprep.subr.mxu1 %v2289_v14 }
 0xe57   :  { %v2843_v25 = vpop.f32.mrf.mxu0  ;;  %v2808_v35 = vpop.f32.mrf.mxu1 }
 0xe58   :  { %v1800_v27 = vmax.f32 %v2843_v25, 1e-30  ;;  %v2280_v25 = vld [vmem:[%s3767_s7 + $0xb0] sm:$0xff] }
 0xe59   :  { %v1790_v29 = vpop.f32.mrf.mxu0  ;;  %v1715_v40 = vpop.f32.mrf.mxu1 }
 0xe5a   :  { %v1799_v32 = vmax.f32 %v1790_v29, 1e-30  ;;  %2937 = vrcp.f32 %v1800_v27  ;;  %v2279_v27 = vld [vmem:[%s3767_s7 + $0xa8] sm:$0xff]  ;;  %v2278_v29 = vld [vmem:[%s3767_s7 + $0xa0] sm:$0xff] }
 0xe5c   :  { %2939 = vrcp.f32 %v1799_v32  ;;  %v2277_v32 = vld [vmem:[%s3767_s7 + $0x98] sm:$0xff] }
 0xe67   :  { %v2938_v38 = vpop.eup %2937 }
 0xe68   :  { %v1804_v42 = vmul.f32 %v2938_v38, %v2808_v35  ;;  %v2276_v35 = vld [vmem:[%s3767_s7 + $0x90] sm:$0xff]  ;;  %v2275_v38 = vld [vmem:[%s3767_s7 + $0x88] sm:$0xff] }
 0xe69   :  { %v2940_v39 = vpop.eup %2939 }
 0xe6a   :  { %v1803_v41 = vmul.f32 %v2940_v39, %v1715_v40  ;;  %v2274_v39 = vld [vmem:[%s3767_s7 + $0x80] sm:$0xff]  ;;  %v1933_v40 = vrot.slane %v3561_v9, %v923_v33  ;;  %v2028_v33 = vrot.slane %v3561_v9, %v1018_v20 }
 0xe6c   :  { %2852 = vmatprep.mubr.msk.f32.mxu1 %vm111_vm0, %v1803_v41 }
 0xe6d   :  { %2853 = vmatmul.mubr.msk.f32.vlgmr.msra.gmra.mxu1 %vm111_vm0, %v1804_v42 }
 0xe6e   :  { %2867 = vmatpush3.msra.mxu1 %v2289_v14 }
 0xe6f   :  { %2868 = vmatprep.subr.mxu1 %v2288_v53 }
 0xe70   :  { %2869 = vmatpush3.msra.mxu1 %v2288_v53 }
 0xe71   :  { %2870 = vmatprep.subr.mxu1 %v2287_v54 }
 0xe72   :  { %2871 = vmatpush3.msra.mxu1 %v2287_v54 }
 0xe73   :  { %2872 = vmatprep.subr.mxu1 %v2286_v17 }
 0xe74   :  { %2873 = vmatpush3.msra.mxu1 %v2286_v17 }
 0xe75   :  { %2874 = vmatprep.subr.mxu1 %v2285_v18 }
 0xe76   :  { %2875 = vmatpush3.msra.mxu1 %v2285_v18 }
 0xe77   :  { %2876 = vmatprep.subr.mxu1 %v2284_v6 }
 0xe78   :  { %2877 = vmatpush3.msra.mxu1 %v2284_v6 }
 0xe79   :  { %2878 = vmatprep.subr.mxu1 %v2283_v23 }
 0xe7a   :  { %2879 = vmatpush3.msra.mxu1 %v2283_v23 }
 0xe7b   :  { %2880 = vmatprep.subr.mxu1 %v2282_v10 }
 0xe7c   :  { %2881 = vmatpush3.msra.mxu1 %v2282_v10  ;;  %v2144_v10 = vld [vmem:[%s3769_s9] sm:$0x3] }
 0xe7d   :  { %2882 = vmatprep.subr.mxu1 %v2281_v52 }
 0xe7e   :  { %2883 = vmatpush3.msra.mxu1 %v2281_v52 }
 0xe7f   :  { %2884 = vmatprep.subr.mxu1 %v2280_v25 }
 0xe80   :  { %2885 = vmatpush3.msra.mxu1 %v2280_v25 }
 0xe81   :  { %2886 = vmatprep.subr.mxu1 %v2279_v27 }
 0xe82   :  { %2887 = vmatpush3.msra.mxu1 %v2279_v27 }
 0xe83   :  { %2888 = vmatprep.subr.mxu1 %v2278_v29 }
 0xe84   :  { %2889 = vmatpush3.msra.mxu1 %v2278_v29 }
 0xe85   :  { %2890 = vmatprep.subr.mxu1 %v2277_v32 }
 0xe86   :  { %2891 = vmatpush3.msra.mxu1 %v2277_v32 }
 0xe87   :  { %2892 = vmatprep.subr.mxu1 %v2276_v35 }
 0xe88   :  { %2893 = vmatpush3.msra.mxu1 %v2276_v35 }
 0xe89   :  { %2894 = vmatprep.subr.mxu1 %v2275_v38 }
 0xe8a   :  { %2895 = vmatpush3.msra.mxu1 %v2275_v38 }
 0xe8b   :  { %2896 = vmatprep.subr.mxu1 %v2274_v39 }
 0xe8c   :  { %2897 = vmatpush3.msra.mxu1 %v2274_v39 }
 0xf2d   :  { %v2854_v44 = vpop.f32.mrf.mxu1 }
 0xf2e   :  { %v1887_v46 = vadd.f32 %v2854_v44, %v1808_v43 }
 0xf2f   :  { %v1881_v45 = vpop.f32.mrf.mxu1 }
 0xf30   :  { %v1882_v47 = vadd.f32 %v1881_v45, %v1808_v43  ;;  %v1891_v50 = vadd.f32 %v1887_v46, %v3551_v26  ;;  %v2273_v26 = vld [vmem:[%s3766_s6 + $0xb8] sm:$0xff]  ;;  %s2226_s6 = sshll.u32 %s2979_s23, 4  ;;  %s2227_s6 = int_to_ptr.vmem [resolvable:$true] %s2226_s6 }
 0xf31   :  { %2855 = vmatprep.subr.mxu0 %v2273_v26  ;;  %s2953_s24 = scalar_lea.vmem %s2227_s6, 32  ;;  %p2958_p1 = scmp.lt.s32.totalorder %s2227_s6, %s2227_s6 }
 0xf32   :  { %v1890_v48 = vadd.f32 %v1882_v47, %v3547_v11  ;;  %v1895_v28 = vsel %vm111_vm0, %v1891_v50, 0.0  ;;  %2856 = vmatpush3.msra.mxu0 %v2273_v26  ;;  %p2954_p0 = scmp.ne.s32.totalorder %s2227_s6, %s2953_s24  ;;  %p2959_p2 = scmp.lt.s32.totalorder %s2953_s24, %s2953_s24 }
 0xf33   :  { %2857 = vmatprep.subr.mxu0 %v2270_v2 }
 0xf34   :  { %v1892_v49 = vsel %vm111_vm0, %v1890_v48, 0.0  ;;  %2858 = vmatpush3.msra.mxu0 %v2270_v2  ;;  %p2960_p3 = por %p2959_p2, %p2958_p1 }
 0xf35   :  { %1893 = vadd.xlane.f32.xlu1 %v1892_v49  ;;  %2859 = vmatprep.subr.mxu0 %v2267_v12 }
 0xf36   :  { %2860 = vmatpush3.msra.mxu0 %v2267_v12  ;;  %p2961_p4 = pnand %p2960_p3, %p2954_p0 }
 0xf37   :  { %2861 = vmatprep.subr.mxu0 %v2264_v31 }
 0xf38   :  { %2862 = vmatpush3.msra.mxu0 %v2264_v31 }
 0xf39   :  { %1896 = vadd.xlane.f32.xlu1 %v1895_v28 }
 0xfbe   :  { %v1894_v21 = vpop.xlane.xlu1 %1893 }
 0xfbf   :  { %v1898_v30 = vmul.f32 0.03125, %v1894_v21 }
 0xfc1   :  { %v1900_v13 = vsub.f32 %v1890_v48, %v1898_v30 }
 0xfc2   :  { %v1897_v15 = vpop.xlane.xlu1 %1896 }
 0xfc3   :  { %v1899_v16 = vmul.f32 0.03125, %v1897_v15  ;;  %v1902_v24 = vmul.f32 %v1900_v13, %v1900_v13 }
 0xfc5   :  { %v1901_v19 = vsub.f32 %v1891_v50, %v1899_v16  ;;  %v1904_v36 = vsel %vm111_vm0, %v1902_v24, 0.0 }
 0xfc6   :  { %1905 = vadd.xlane.f32.xlu1 %v1904_v36 }
 0xfc7   :  { %v1903_v37 = vmul.f32 %v1901_v19, %v1901_v19 }
 0xfc9   :  { %v1907_v11 = vsel %vm111_vm0, %v1903_v37, 0.0 }
 0xfca   :  { %1908 = vadd.xlane.f32.xlu1 %v1907_v11 }
0x104f   :  { %v1906_v55 = vpop.xlane.xlu1 %1905 }
0x1050   :  { %v1910_v56 = vmul.f32 0.03125, %v1906_v55 }
0x1052   :  { %v1912_v57 = vadd.f32 1e-12, %v1910_v56 }
0x1053   :  { %v1909_v58 = vpop.xlane.xlu1 %1908 }
0x1054   :  { %2941 = vrsqrt.f32 %v1912_v57  ;;  %v1911_v59 = vmul.f32 0.03125, %v1909_v58  ;;  %v2977_v58 = vmov 0.0  }
0x1055   :  { %2901 = vmatprep.subr.mxu0 %v2977_v58 }
0x1056   :  { %v1913_v60 = vadd.f32 1e-12, %v1911_v59 }
0x1058   :  { %2943 = vrsqrt.f32 %v1913_v60 }
0x1061   :  { %v2942_v62 = vpop.eup %2941 }
0x1062   :  { %v1916_v63 = vmul.f32 %v2942_v62, %v1900_v13 }
0x1064   :  { %v1922_v1 = vmul.f32 %v1921_v61, %v1916_v63 }
0x1065   :  { %v2944_v3 = vpop.eup %2943 }
0x1066   :  { %v1917_v51 = vmul.f32 %v2944_v3, %v1901_v19  ;;  %v3688_v22 = vadd.f32 %v1927_v0, %v1922_v1  ;;  %v2135_v1 = vrot.slane %v3561_v9, %v1125_v8 }
0x1068   :  { %v1923_v4 = vmul.f32 %v1921_v61, %v1917_v51  ;;  %2863 = vmatprep.mubr.msk.f32.mxu0 %vm111_vm0, %v3688_v22 }
0x106a   :  { %v3692_v5 = vadd.f32 %v1927_v0, %v1923_v4 }
0x106c   :  { %2864 = vmatmul.mubr.msk.f32.vlgmr.msra.gmra.mxu0 %vm111_vm0, %v3692_v5 }
0x106d   :  { %2905 = vmatprep.mubr.msk.f32.mxu0 %vm2978_vm2, %v2977_v58 }
0x112c   :  { %v2865_v41 = vpop.f32.mrf.mxu0 }
0x112d   :  { %v2012_v42 = vadd.f32 %v2865_v41, %v1933_v40 }
0x112e   :  { %v2006_v43 = vpop.f32.mrf.mxu0 }
0x112f   :  { %v2018_v44 = vmul.f32 0.70710677, %v2012_v42  ;;  %v2007_v45 = vadd.f32 %v2006_v43, %v1933_v40  ;;  %v2016_v21 = vmul.f32 0.5, %v2012_v42 }
0x1131   :  { %2945 = verf.f32 %v2018_v44  ;;  %v2017_v46 = vmul.f32 0.70710677, %v2007_v45  ;;  %v2015_v50 = vmul.f32 0.5, %v2007_v45 }
0x1133   :  { %2947 = verf.f32 %v2017_v46 }
0x113e   :  { %v2946_v47 = vpop.eup %2945 }
0x113f   :  { %v2022_v49 = vadd.f32 1.0, %v2946_v47 }
0x1140   :  { %v2948_v48 = vpop.eup %2947 }
0x1141   :  { %v2021_v28 = vadd.f32 1.0, %v2948_v48  ;;  %v2024_v13 = vmul.f32 %v2022_v49, %v2016_v21 }
0x1143   :  { %v2023_v30 = vmul.f32 %v2021_v28, %v2015_v50 }
0x1145   :  { %2898 = vmatprep.mubr.f32.mxu1 %v2023_v30 }
0x1146   :  { %2899 = vmatmul.mubr.f32.vlgmr.msra.gmra.mxu1 %v2024_v13 }
0x1206   :  { %v2900_v15 = vpop.f32.mrf.mxu1 }
0x1207   :  { %v2101_v16 = vadd.f32 %v2900_v15, %v2028_v33 }
0x1208   :  { %v2095_v24 = vpop.f32.mrf.mxu1 }
0x1209   :  { %v2096_v19 = vadd.f32 %v2095_v24, %v2028_v33  ;;  %v2105_v36 = vadd.f32 %v2101_v16, %v3692_v5 }
0x120b   :  { %v2109_v37 = vsel %vm111_vm0, %v2105_v36, 0.0  ;;  %v2104_v11 = vadd.f32 %v2096_v19, %v3688_v22  ;;  %v2141_v22 = vrot.slane %v3561_v9, %v1131_v34 }
0x120c   :  { %2110 = vadd.xlane.f32.xlu1 %v2109_v37 }
0x120d   :  { %v2106_v26 = vsel %vm111_vm0, %v2104_v11, 0.0 }
0x1210   :  { %2107 = vadd.xlane.f32.xlu1 %v2106_v26 }
0x1295   :  { %v2111_v2 = vpop.xlane.xlu1 %2110 }
0x1296   :  { %v2113_v12 = vmul.f32 0.03125, %v2111_v2 }
0x1298   :  { %v2115_v31 = vsub.f32 %v2105_v36, %v2113_v12 }
0x1299   :  { %v2108_v14 = vpop.xlane.xlu1 %2107 }
0x129a   :  { %v2112_v53 = vmul.f32 0.03125, %v2108_v14  ;;  %v2117_v20 = vmul.f32 %v2115_v31, %v2115_v31 }
0x129c   :  { %v2114_v54 = vsub.f32 %v2104_v11, %v2112_v53  ;;  %v2121_v55 = vsel %vm111_vm0, %v2117_v20, 0.0 }
0x129d   :  { %2122 = vadd.xlane.f32.xlu1 %v2121_v55 }
0x129e   :  { %v2116_v56 = vmul.f32 %v2114_v54, %v2114_v54 }
0x12a0   :  { %v2118_v57 = vsel %vm111_vm0, %v2116_v56, 0.0 }
0x12a1   :  { %2119 = vadd.xlane.f32.xlu1 %v2118_v57 }
0x1326   :  { %v2123_v59 = vpop.xlane.xlu1 %2122 }
0x1327   :  { %v2125_v60 = vmul.f32 0.03125, %v2123_v59 }
0x1329   :  { %v2127_v61 = vadd.f32 1e-12, %v2125_v60 }
0x132a   :  { %v2120_v62 = vpop.xlane.xlu1 %2119 }
0x132b   :  { %2949 = vrsqrt.f32 %v2127_v61  ;;  %v2124_v63 = vmul.f32 0.03125, %v2120_v62 }
0x132d   :  { %v2126_v0 = vadd.f32 1e-12, %v2124_v63 }
0x132f   :  { %2951 = vrsqrt.f32 %v2126_v0 }
0x1338   :  { %v2950_v3 = vpop.eup %2949 }
0x1339   :  { %v2131_v51 = vmul.f32 %v2950_v3, %v2115_v31 }
0x133b   :  { %v2137_v4 = vmul.f32 %v2135_v1, %v2131_v51 }
0x133c   :  { %v2952_v5 = vpop.eup %2951 }
0x133d   :  { %v2143_v17 = vadd.f32 %v2141_v22, %v2137_v4  ;;  %v2130_v18 = vmul.f32 %v2952_v5, %v2114_v54 }
0x133f   :  { %2902 = vmatpush3.msra.mxu0 %v2143_v17  ;;  %v2136_v6 = vmul.f32 %v2135_v1, %v2130_v18 }
0x1340   :  { %2903 = vmatprep.subr.mxu0 %v2977_v58 }
0x1341   :  { %v2142_v23 = vadd.f32 %v2141_v22, %v2136_v6 }
0x1343   :  { %2904 = vmatpush3.msra.mxu0 %v2142_v23 }
0x1344   :  { %2906 = vmatmul.mubr.msk.f32.vlgmr.msra.gmra.mxu0 %vm233_vm1, %v2144_v10 }
0x1404   :  { %v2214_v7 = vpop.f32.mrf.mxu0 }
0x1405   :  { %2219 = vst.msk [vmem:[#allocation2] sm:$0x3] %vm2218_vm3, %v2214_v7 }
0x1406   :  { %v2907_v8 = vpop.f32.mrf.mxu0 }
0x1407   :  { %2964 = shalt.err (!%p2961_p4)
}
0x1408   :  { %2229 = dma.vmem_to_hbm [thread:$0]  %s2227_s6, 32, %s3770_s10, [#allocation3]  }
0x1409   :  { %2973 = dma.done.wait [#allocation3], 32  }
0x140a   :  { %2974 = vsyncadd [#allocation3], 4294967264 }
0x140b   :  { %2233 = vsyncpa [#allocation3], 1 }

</bundles_post_ra>
